<compile_context>
chip_gen: v7x
topology: tpu7x:2x2x1
jax: 0.10.0
libtpu: 0.0.40
codegen_flags: <defaults>
</compile_context>

<pallas_src>
import jax
import jax.numpy as jnp
from jax.experimental import pallas as pl
from jax.experimental.pallas import tpu as pltpu

LANE = 128


def _round_up(x, m):
    return (x + m - 1) // m * m


def _pad_to(x, shape):
    return jnp.pad(x, [(0, s - d) for d, s in zip(x.shape, shape)])


def _choose_tile_rows(rows, target, unit=16, min_split=128):
    """Row-tile size: a multiple of `unit`, <= `target`.  When the whole
    problem would otherwise fit in one tile but is big enough, split it in two
    so the "parallel" grid axis spans both v7x TensorCores."""
    rp = _round_up(rows, unit)
    if rp > target:
        return target                       # grid already has >= 2 steps
    if rp >= 2 * min_split:
        return _round_up((rp + 1) // 2, unit)
    return rp


# ---------------------------------------------------------------------------
# Pallas kernels
# ---------------------------------------------------------------------------

def _conv_tanh_pool_kernel(x_ref, w_ref, b_ref, o_ref, acc_ref):
    """One (row-tile, pool-quadrant) grid step of Conv2d + Tanh + AvgPool2d(2,2).

    x_ref:   (tg, Kp)  bf16  im2col rows of one 2x2-pool quadrant
    w_ref:   (Kp, 128) bf16  zero-padded conv weight
    b_ref:   (1, 128)  f32   zero-padded bias
    o_ref:   (tg, 128) bf16  pooled output tile
    acc_ref: (tg, 128) f32   running sum of tanh(conv) over the 4 quadrants
    """
    q = pl.program_id(1)

    @pl.when(q == 0)
    def _():
        acc_ref[...] = jnp.zeros_like(acc_ref)

    y = jnp.dot(x_ref[...], w_ref[...], preferred_element_type=jnp.float32)
    acc_ref[...] += jnp.tanh(y + b_ref[...])          # f32 tanh (v5e-safe)

    @pl.when(q == pl.num_programs(1) - 1)
    def _():
        o_ref[...] = (acc_ref[...] * 0.25).astype(o_ref.dtype)


def _fused_tail_kernel(x_ref, w3_ref, b3_ref, w4_ref, b4_ref, w5_ref, b5_ref,
                       o_ref):
    """Fused conv3(5x5 -> 1x1 spatial) + tanh + fc1 + tanh + fc2.

    All intermediates stay in VMEM/vregs; padded lanes remain exactly zero
    because padded weight rows/cols and biases are zero and tanh(0)=0.
    """
    y = jnp.dot(x_ref[...], w3_ref[...], preferred_element_type=jnp.float32)
    y = jnp.tanh(y + b3_ref[...])                                   # conv3 act
    y = jnp.dot(y.astype(jnp.bfloat16), w4_ref[...],
                preferred_element_type=jnp.float32)
    y = jnp.tanh(y + b4_ref[...])                                   # fc1 act
    y = jnp.dot(y.astype(jnp.bfloat16), w5_ref[...],
                preferred_element_type=jnp.float32)
    o_ref[...] = y + b5_ref[...]                                    # fc2 logits


# ---------------------------------------------------------------------------
# Pallas wrappers
# ---------------------------------------------------------------------------

def conv_tanh_pool_layer(x_nhwc, w_pad, b_pad, *, k, padding, tile_rows=512):
    """Conv2d(k, stride=1, `padding`) + Tanh + AvgPool2d(2,2) in ONE pallas_call.

    x_nhwc: (N, H, W, C) with only the real channels.  Returns
    (N, Ho//2, Wo//2, 128) bf16; lanes >= real out-channel count are exactly 0.
    """
    N, H, W, C = x_nhwc.shape
    Kp, Cp = w_pad.shape
    K = C * k * k

    # --- glue (single bf16 pass): im2col built directly in pool-quadrant-major
    # row order, one pad covering both the row and contraction dims. ---
    xb = x_nhwc.astype(jnp.bfloat16)
    if padding:
        xb = jnp.pad(xb, ((0, 0), (padding, padding), (padding, padding), (0, 0)))
    Ho = xb.shape[1] - k + 1
    Wo = xb.shape[2] - k + 1
    Hh, Wh = Ho // 2, Wo // 2

    # Feature index = c*k*k + i*k + j  (matches torch weight.reshape(outC, -1)).
    cols = [xb[:, i:i + Ho, j:j + Wo, :] for i in range(k) for j in range(k)]
    patches = jnp.stack(cols, axis=-1).reshape(N, Ho, Wo, K)
    # Rows ordered (a, b, n, ho, jo): (a, b) = position inside the 2x2 pooling
    # window, so the kernel's reduction axis is a contiguous leading dim.
    patches = patches.reshape(N, Hh, 2, Wh, 2, K).transpose(2, 4, 0, 1, 3, 5)
    patches = patches.reshape(4, N * Hh * Wh, K)

    G = N * Hh * Wh
    tg = _choose_tile_rows(G, target=tile_rows)
    Gp = _round_up(G, tg)
    patches = jnp.pad(patches, ((0, 0), (0, Gp - G), (0, Kp - K)))

    cost = pl.CostEstimate(
        flops=2 * 4 * Gp * Kp * Cp,
        transcendentals=4 * Gp * Cp,
        bytes_accessed=4 * Gp * Kp * 2 + Kp * Cp * 2 + Gp * Cp * 2,
    )
    out = pl.pallas_call(
        _conv_tanh_pool_kernel,
        out_shape=jax.ShapeDtypeStruct((Gp, Cp), jnp.bfloat16),
        grid=(Gp // tg, 4),
        in_specs=[
            pl.BlockSpec((None, tg, Kp), lambda i, q: (q, i, 0)),
            pl.BlockSpec((Kp, Cp), lambda i, q: (0, 0)),
            pl.BlockSpec((1, Cp), lambda i, q: (0, 0)),
        ],
        out_specs=pl.BlockSpec((tg, Cp), lambda i, q: (i, 0)),
        scratch_shapes=[pltpu.VMEM((tg, Cp), jnp.float32)],
        compiler_params=pltpu.CompilerParams(
            dimension_semantics=("parallel", "arbitrary"),
            vmem_limit_bytes=32 * 1024 * 1024),
        cost_estimate=cost,
    )(patches, w_pad, b_pad)
    return out[:G].reshape(N, Hh, Wh, Cp)


def pallas_fused_tail(x, w3, b3, w4, b4, w5, b5, *, tile_m=256):
    """x: (M, K<=512) -> (M, 128) f32.  Three chained matmuls, M-tiled."""
    M, K = x.shape
    Kp = w3.shape[0]
    Np = w5.shape[1]
    tm = _choose_tile_rows(M, target=tile_m)
    Mp = _round_up(M, tm)
    xp = jnp.pad(x.astype(jnp.bfloat16), ((0, Mp - M), (0, Kp - K)))
    out = pl.pallas_call(
        _fused_tail_kernel,
        out_shape=jax.ShapeDtypeStruct((Mp, Np), jnp.float32),
        grid=(Mp // tm,),
        in_specs=[
            pl.BlockSpec((tm, Kp), lambda i: (i, 0)),
            pl.BlockSpec(w3.shape, lambda i: (0, 0)),
            pl.BlockSpec(b3.shape, lambda i: (0, 0)),
            pl.BlockSpec(w4.shape, lambda i: (0, 0)),
            pl.BlockSpec(b4.shape, lambda i: (0, 0)),
            pl.BlockSpec(w5.shape, lambda i: (0, 0)),
            pl.BlockSpec(b5.shape, lambda i: (0, 0)),
        ],
        out_specs=pl.BlockSpec((tm, Np), lambda i: (i, 0)),
        compiler_params=pltpu.CompilerParams(
            dimension_semantics=("parallel",),
            vmem_limit_bytes=32 * 1024 * 1024),
    )(xp, w3, b3, w4, b4, w5, b5)
    return out[:M]


# ---------------------------------------------------------------------------
# LeNet parameters (PyTorch layout) + one-time prep (pad/transpose/bf16)
# ---------------------------------------------------------------------------

def init_lenet_params(key):
    def conv_p(key, outc, inc, k):
        k1, k2 = jax.random.split(key)
        scale = 1.0 / (inc * k * k) ** 0.5
        return (jax.random.normal(k1, (outc, inc, k, k), jnp.float32) * scale,
                jax.random.normal(k2, (outc,), jnp.float32) * scale)

    def fc_p(key, outf, inf):
        k1, k2 = jax.random.split(key)
        scale = 1.0 / inf ** 0.5
        return (jax.random.normal(k1, (outf, inf), jnp.float32) * scale,
                jax.random.normal(k2, (outf,), jnp.float32) * scale)

    ks = jax.random.split(key, 5)
    p = {}
    p["cnn1_w"], p["cnn1_b"] = conv_p(ks[0], 6, 1, 5)
    p["cnn2_w"], p["cnn2_b"] = conv_p(ks[1], 16, 6, 5)
    p["cnn3_w"], p["cnn3_b"] = conv_p(ks[2], 120, 16, 5)
    p["fc1_w"], p["fc1_b"] = fc_p(ks[3], 84, 120)
    p["fc2_w"], p["fc2_b"] = fc_p(ks[4], 10, 84)
    return p


def prepare_lenet_params(p):
    """One-time: flatten/transpose weights to (Kpad, Npad) bf16, biases to
    (1, Npad) f32, zero-padded to multiples of 128 (padded lanes stay zero
    through tanh, so downstream slices are exact)."""
    def conv_w(w):
        outc = w.shape[0]
        K = w.shape[1] * w.shape[2] * w.shape[3]
        wm = w.reshape(outc, K).T                                  # (K, outC)
        return _pad_to(wm, (_round_up(K, LANE),
                            _round_up(outc, LANE))).astype(jnp.bfloat16)

    def fc_w(w):
        outf, inf = w.shape
        return _pad_to(w.T, (_round_up(inf, LANE),
                             _round_up(outf, LANE))).astype(jnp.bfloat16)

    def bias(b):
        return _pad_to(b.reshape(1, -1),
                       (1, _round_up(b.shape[0], LANE))).astype(jnp.float32)

    return {
        "w1": conv_w(p["cnn1_w"]), "b1": bias(p["cnn1_b"]),
        "w2": conv_w(p["cnn2_w"]), "b2": bias(p["cnn2_b"]),
        "w3": conv_w(p["cnn3_w"]), "b3": bias(p["cnn3_b"]),
        "w4": fc_w(p["fc1_w"]),    "b4": bias(p["fc1_b"]),
        "w5": fc_w(p["fc2_w"]),    "b5": bias(p["fc2_b"]),
    }


# ---------------------------------------------------------------------------
# Forward
# ---------------------------------------------------------------------------

def lenet_forward(prep, x):
    # x: (N, 1, 28, 28) NCHW float32 (PyTorch layout)
    N = x.shape[0]
    x = x.transpose(0, 2, 3, 1)                                    # NHWC

    # conv1 + tanh + avgpool fused -> (N, 14, 14, 128) bf16 (6 real channels)
    y = conv_tanh_pool_layer(x, prep["w1"], prep["b1"], k=5, padding=2)
    # NOTE: remaining lane-padding amplification (6/128, 16/128 real lanes)
    # could be removed by packing pooled spatial positions with channels into
    # the 128 output lanes; not done here to keep the im2col glue simple.
    # conv2 + tanh + avgpool fused -> (N, 5, 5, 128) bf16 (16 real channels)
    y = conv_tanh_pool_layer(y[..., :6], prep["w2"], prep["b2"], k=5, padding=0)

    # conv3 (5x5 window == whole 5x5 map) + tanh + fc1 + tanh + fc2, fused.
    # conv3's im2col is just a (c, i, j)-ordered flatten of the 5x5x16 patch.
    p = y[..., :16].transpose(0, 3, 1, 2).reshape(N, 16 * 5 * 5)   # (N, 400)
    out = pallas_fused_tail(p, prep["w3"], prep["b3"],
                            prep["w4"], prep["b4"],
                            prep["w5"], prep["b5"])                # (N, 128)
    return out[:, :10]                                             # (N, 10)


if __name__ == "__main__":
    key = jax.random.PRNGKey(0)
    k_param, k_x = jax.random.split(key)
    params = init_lenet_params(k_param)
    prepared = prepare_lenet_params(params)      # weight prep done ONCE
    # LeNet geometry requires 28x28 single-channel input; small batch.
    x = jax.random.normal(k_x, (2, 1, 28, 28), jnp.float32)

    out = jax.jit(lenet_forward)(prepared, x)
    out = jax.block_until_ready(out)
    assert out.shape == (2, 10) and out.dtype == jnp.float32
    print("KERNEL_OK")
</pallas_src>

<mosaic_0001>
module attributes {stable_mosaic.version = 11 : i64} {
  func.func @_conv_tanh_pool_kernel(%arg0: i32, %arg1: i32, %arg2: memref<1x208x128xbf16, #tpu.memory_space<vmem>>, %arg3: memref<128x128xbf16, #tpu.memory_space<vmem>>, %arg4: memref<1x128xf32, #tpu.memory_space<vmem>>, %arg5: memref<208x128xbf16, #tpu.memory_space<vmem>>, %arg6: memref<208x128xf32, #tpu.memory_space<vmem>>) attributes {dimension_semantics = [#tpu.dimension_semantics<parallel>, #tpu.dimension_semantics<arbitrary>], iteration_bounds = array<i64: 2, 4>, scalar_prefetch = 0 : i64, scratch_operands = 1 : i64, tpu.core_type = #tpu.core_type<tc>, window_params = [{transform_indices = @transform_0, window_bounds = array<i64: 1, 208, 128>}, {pipeline_mode = #tpu.pipeline_mode<synchronous>, transform_indices = @transform_1, window_bounds = array<i64: 128, 128>}, {pipeline_mode = #tpu.pipeline_mode<synchronous>, transform_indices = @transform_2, window_bounds = array<i64: 1, 128>}, {transform_indices = @transform_3, window_bounds = array<i64: 208, 128>}]} {
    %c0_i32 = arith.constant 0 : i32
    %0 = arith.cmpi eq, %arg1, %c0_i32 : i32
    %1 = arith.extui %0 : i1 to i32
    %c0_i32_0 = arith.constant 0 : i32
    %2 = arith.cmpi ne, %1, %c0_i32_0 : i32
    scf.if %2 {
      %cst_12 = arith.constant 0.000000e+00 : f32
      %17 = vector.broadcast %cst_12 : f32 to vector<208x128xf32>
      %c0_13 = arith.constant 0 : index
      %c0_14 = arith.constant 0 : index
      %18 = vector.load %arg6[%c0_13, %c0_14] : memref<208x128xf32, #tpu.memory_space<vmem>>, vector<208x128xf32>
      tpu.vector_store %arg6[%c0_13, %c0_14], %17 {strides = array<i32>} : memref<208x128xf32, #tpu.memory_space<vmem>>, vector<208x128xf32>,
    } else {
    }
    %c0 = arith.constant 0 : index
    %c0_1 = arith.constant 0 : index
    %c0_2 = arith.constant 0 : index
    %3 = vector.load %arg2[%c0, %c0_1, %c0_2] : memref<1x208x128xbf16, #tpu.memory_space<vmem>>, vector<1x208x128xbf16>
    %4 = vector.shape_cast %3 : vector<1x208x128xbf16> to vector<208x128xbf16>
    %c0_3 = arith.constant 0 : index
    %c0_4 = arith.constant 0 : index
    %5 = vector.load %arg3[%c0_3, %c0_4] : memref<128x128xbf16, #tpu.memory_space<vmem>>, vector<128x128xbf16>
    %cst = arith.constant dense<0.000000e+00> : vector<208x128xf32>
    %6 = tpu.matmul %4, %5, %cst {dimension_numbers = #tpu.dot_dimension_numbers<[1], [0], [0], [1], [0, 0, 1, 1], [], []>} : vector<208x128xbf16>, vector<128x128xbf16>, vector<208x128xf32> -> vector<208x128xf32>
    %c0_5 = arith.constant 0 : index
    %c0_6 = arith.constant 0 : index
    %7 = vector.load %arg6[%c0_5, %c0_6] : memref<208x128xf32, #tpu.memory_space<vmem>>, vector<208x128xf32>
    %c0_7 = arith.constant 0 : index
    %c0_8 = arith.constant 0 : index
    %8 = vector.load %arg4[%c0_7, %c0_8] : memref<1x128xf32, #tpu.memory_space<vmem>>, vector<1x128xf32>
    %9 = vector.broadcast %8 : vector<1x128xf32> to vector<208x128xf32>
    %10 = arith.addf %6, %9 : vector<208x128xf32>
    %11 = math.tanh %10 : vector<208x128xf32>
    %12 = arith.addf %7, %11 : vector<208x128xf32>
    %c0_9 = arith.constant 0 : index
    %c0_10 = arith.constant 0 : index
    %13 = vector.load %arg6[%c0_9, %c0_10] : memref<208x128xf32, #tpu.memory_space<vmem>>, vector<208x128xf32>
    tpu.vector_store %arg6[%c0_9, %c0_10], %12 {strides = array<i32>} : memref<208x128xf32, #tpu.memory_space<vmem>>, vector<208x128xf32>,
    %c3_i32 = arith.constant 3 : i32
    %14 = arith.cmpi eq, %arg1, %c3_i32 : i32
    %15 = arith.extui %14 : i1 to i32
    %c0_i32_11 = arith.constant 0 : i32
    %16 = arith.cmpi ne, %15, %c0_i32_11 : i32
    scf.if %16 {
      %c0_12 = arith.constant 0 : index
      %c0_13 = arith.constant 0 : index
      %17 = vector.load %arg6[%c0_12, %c0_13] : memref<208x128xf32, #tpu.memory_space<vmem>>, vector<208x128xf32>
      %cst_14 = arith.constant 2.500000e-01 : f32
      %18 = vector.broadcast %cst_14 : f32 to vector<208x128xf32>
      %19 = arith.mulf %17, %18 : vector<208x128xf32>
      %20 = arith.truncf %19 : vector<208x128xf32> to vector<208x128xbf16>
      %c0_15 = arith.constant 0 : index
      %c0_16 = arith.constant 0 : index
      %21 = vector.load %arg5[%c0_15, %c0_16] : memref<208x128xbf16, #tpu.memory_space<vmem>>, vector<208x128xbf16>
      tpu.vector_store %arg5[%c0_15, %c0_16], %20 {strides = array<i32>} : memref<208x128xbf16, #tpu.memory_space<vmem>>, vector<208x128xbf16>,
    } else {
    }
    return
  }
  func.func @transform_0(%arg0: i32, %arg1: i32) -> (i32, i32, i32) {
    %c0_i32 = arith.constant 0 : i32
    %c0_i32_0 = arith.constant 0 : i32
    return %arg1, %arg0, %c0_i32 : i32, i32, i32
  }
  func.func @transform_1(%arg0: i32, %arg1: i32) -> (i32, i32) {
    %c0_i32 = arith.constant 0 : i32
    %c0_i32_0 = arith.constant 0 : i32
    %c0_i32_1 = arith.constant 0 : i32
    return %c0_i32, %c0_i32_0 : i32, i32
  }
  func.func @transform_2(%arg0: i32, %arg1: i32) -> (i32, i32) {
    %c0_i32 = arith.constant 0 : i32
    %c0_i32_0 = arith.constant 0 : i32
    %c0_i32_1 = arith.constant 0 : i32
    return %c0_i32, %c0_i32_0 : i32, i32
  }
  func.func @transform_3(%arg0: i32, %arg1: i32) -> (i32, i32) {
    %c0_i32 = arith.constant 0 : i32
    %c0_i32_0 = arith.constant 0 : i32
    return %arg0, %c0_i32 : i32, i32
  }
}

module attributes {stable_mosaic.version = 11 : i64} {
  func.func @_conv_tanh_pool_kernel(%arg0: i32, %arg1: i32, %arg2: memref<1x64x256xbf16, #tpu.memory_space<vmem>>, %arg3: memref<256x128xbf16, #tpu.memory_space<vmem>>, %arg4: memref<1x128xf32, #tpu.memory_space<vmem>>, %arg5: memref<64x128xbf16, #tpu.memory_space<vmem>>, %arg6: memref<64x128xf32, #tpu.memory_space<vmem>>) attributes {dimension_semantics = [#tpu.dimension_semantics<parallel>, #tpu.dimension_semantics<arbitrary>], iteration_bounds = array<i64: 1, 4>, scalar_prefetch = 0 : i64, scratch_operands = 1 : i64, tpu.core_type = #tpu.core_type<tc>, window_params = [{transform_indices = @transform_0, window_bounds = array<i64: 1, 64, 256>}, {pipeline_mode = #tpu.pipeline_mode<synchronous>, transform_indices = @transform_1, window_bounds = array<i64: 256, 128>}, {pipeline_mode = #tpu.pipeline_mode<synchronous>, transform_indices = @transform_2, window_bounds = array<i64: 1, 128>}, {transform_indices = @transform_3, window_bounds = array<i64: 64, 128>}]} {
    %c0_i32 = arith.constant 0 : i32
    %0 = arith.cmpi eq, %arg1, %c0_i32 : i32
    %1 = arith.extui %0 : i1 to i32
    %c0_i32_0 = arith.constant 0 : i32
    %2 = arith.cmpi ne, %1, %c0_i32_0 : i32
    scf.if %2 {
      %cst_12 = arith.constant 0.000000e+00 : f32
      %17 = vector.broadcast %cst_12 : f32 to vector<64x128xf32>
      %c0_13 = arith.constant 0 : index
      %c0_14 = arith.constant 0 : index
      %18 = vector.load %arg6[%c0_13, %c0_14] : memref<64x128xf32, #tpu.memory_space<vmem>>, vector<64x128xf32>
      tpu.vector_store %arg6[%c0_13, %c0_14], %17 {strides = array<i32>} : memref<64x128xf32, #tpu.memory_space<vmem>>, vector<64x128xf32>,
    } else {
    }
    %c0 = arith.constant 0 : index
    %c0_1 = arith.constant 0 : index
    %c0_2 = arith.constant 0 : index
    %3 = vector.load %arg2[%c0, %c0_1, %c0_2] : memref<1x64x256xbf16, #tpu.memory_space<vmem>>, vector<1x64x256xbf16>
    %4 = vector.shape_cast %3 : vector<1x64x256xbf16> to vector<64x256xbf16>
    %c0_3 = arith.constant 0 : index
    %c0_4 = arith.constant 0 : index
    %5 = vector.load %arg3[%c0_3, %c0_4] : memref<256x128xbf16, #tpu.memory_space<vmem>>, vector<256x128xbf16>
    %cst = arith.constant dense<0.000000e+00> : vector<64x128xf32>
    %6 = tpu.matmul %4, %5, %cst {dimension_numbers = #tpu.dot_dimension_numbers<[1], [0], [0], [1], [0, 0, 1, 1], [], []>} : vector<64x256xbf16>, vector<256x128xbf16>, vector<64x128xf32> -> vector<64x128xf32>
    %c0_5 = arith.constant 0 : index
    %c0_6 = arith.constant 0 : index
    %7 = vector.load %arg6[%c0_5, %c0_6] : memref<64x128xf32, #tpu.memory_space<vmem>>, vector<64x128xf32>
    %c0_7 = arith.constant 0 : index
    %c0_8 = arith.constant 0 : index
    %8 = vector.load %arg4[%c0_7, %c0_8] : memref<1x128xf32, #tpu.memory_space<vmem>>, vector<1x128xf32>
    %9 = vector.broadcast %8 : vector<1x128xf32> to vector<64x128xf32>
    %10 = arith.addf %6, %9 : vector<64x128xf32>
    %11 = math.tanh %10 : vector<64x128xf32>
    %12 = arith.addf %7, %11 : vector<64x128xf32>
    %c0_9 = arith.constant 0 : index
    %c0_10 = arith.constant 0 : index
    %13 = vector.load %arg6[%c0_9, %c0_10] : memref<64x128xf32, #tpu.memory_space<vmem>>, vector<64x128xf32>
    tpu.vector_store %arg6[%c0_9, %c0_10], %12 {strides = array<i32>} : memref<64x128xf32, #tpu.memory_space<vmem>>, vector<64x128xf32>,
    %c3_i32 = arith.constant 3 : i32
    %14 = arith.cmpi eq, %arg1, %c3_i32 : i32
    %15 = arith.extui %14 : i1 to i32
    %c0_i32_11 = arith.constant 0 : i32
    %16 = arith.cmpi ne, %15, %c0_i32_11 : i32
    scf.if %16 {
      %c0_12 = arith.constant 0 : index
      %c0_13 = arith.constant 0 : index
      %17 = vector.load %arg6[%c0_12, %c0_13] : memref<64x128xf32, #tpu.memory_space<vmem>>, vector<64x128xf32>
      %cst_14 = arith.constant 2.500000e-01 : f32
      %18 = vector.broadcast %cst_14 : f32 to vector<64x128xf32>
      %19 = arith.mulf %17, %18 : vector<64x128xf32>
      %20 = arith.truncf %19 : vector<64x128xf32> to vector<64x128xbf16>
      %c0_15 = arith.constant 0 : index
      %c0_16 = arith.constant 0 : index
      %21 = vector.load %arg5[%c0_15, %c0_16] : memref<64x128xbf16, #tpu.memory_space<vmem>>, vector<64x128xbf16>
      tpu.vector_store %arg5[%c0_15, %c0_16], %20 {strides = array<i32>} : memref<64x128xbf16, #tpu.memory_space<vmem>>, vector<64x128xbf16>,
    } else {
    }
    return
  }
  func.func @transform_0(%arg0: i32, %arg1: i32) -> (i32, i32, i32) {
    %c0_i32 = arith.constant 0 : i32
    %c0_i32_0 = arith.constant 0 : i32
    return %arg1, %arg0, %c0_i32 : i32, i32, i32
  }
  func.func @transform_1(%arg0: i32, %arg1: i32) -> (i32, i32) {
    %c0_i32 = arith.constant 0 : i32
    %c0_i32_0 = arith.constant 0 : i32
    %c0_i32_1 = arith.constant 0 : i32
    return %c0_i32, %c0_i32_0 : i32, i32
  }
  func.func @transform_2(%arg0: i32, %arg1: i32) -> (i32, i32) {
    %c0_i32 = arith.constant 0 : i32
    %c0_i32_0 = arith.constant 0 : i32
    %c0_i32_1 = arith.constant 0 : i32
    return %c0_i32, %c0_i32_0 : i32, i32
  }
  func.func @transform_3(%arg0: i32, %arg1: i32) -> (i32, i32) {
    %c0_i32 = arith.constant 0 : i32
    %c0_i32_0 = arith.constant 0 : i32
    return %arg0, %c0_i32 : i32, i32
  }
}

module attributes {stable_mosaic.version = 11 : i64} {
  func.func @_fused_tail_kernel(%arg0: i32, %arg1: memref<16x512xbf16, #tpu.memory_space<vmem>>, %arg2: memref<512x128xbf16, #tpu.memory_space<vmem>>, %arg3: memref<1x128xf32, #tpu.memory_space<vmem>>, %arg4: memref<128x128xbf16, #tpu.memory_space<vmem>>, %arg5: memref<1x128xf32, #tpu.memory_space<vmem>>, %arg6: memref<128x128xbf16, #tpu.memory_space<vmem>>, %arg7: memref<1x128xf32, #tpu.memory_space<vmem>>, %arg8: memref<16x128xf32, #tpu.memory_space<vmem>>) attributes {dimension_semantics = [#tpu.dimension_semantics<parallel>], iteration_bounds = array<i64: 1>, scalar_prefetch = 0 : i64, scratch_operands = 0 : i64, tpu.core_type = #tpu.core_type<tc>, window_params = [{transform_indices = @transform_0, window_bounds = array<i64: 16, 512>}, {pipeline_mode = #tpu.pipeline_mode<synchronous>, transform_indices = @transform_1, window_bounds = array<i64: 512, 128>}, {pipeline_mode = #tpu.pipeline_mode<synchronous>, transform_indices = @transform_2, window_bounds = array<i64: 1, 128>}, {pipeline_mode = #tpu.pipeline_mode<synchronous>, transform_indices = @transform_3, window_bounds = array<i64: 128, 128>}, {pipeline_mode = #tpu.pipeline_mode<synchronous>, transform_indices = @transform_4, window_bounds = array<i64: 1, 128>}, {pipeline_mode = #tpu.pipeline_mode<synchronous>, transform_indices = @transform_5, window_bounds = array<i64: 128, 128>}, {pipeline_mode = #tpu.pipeline_mode<synchronous>, transform_indices = @transform_6, window_bounds = array<i64: 1, 128>}, {transform_indices = @transform_7, window_bounds = array<i64: 16, 128>}]} {
    %c0 = arith.constant 0 : index
    %c0_0 = arith.constant 0 : index
    %0 = vector.load %arg1[%c0, %c0_0] : memref<16x512xbf16, #tpu.memory_space<vmem>>, vector<16x512xbf16>
    %c0_1 = arith.constant 0 : index
    %c0_2 = arith.constant 0 : index
    %1 = vector.load %arg2[%c0_1, %c0_2] : memref<512x128xbf16, #tpu.memory_space<vmem>>, vector<512x128xbf16>
    %cst = arith.constant dense<0.000000e+00> : vector<16x128xf32>
    %2 = tpu.matmul %0, %1, %cst {dimension_numbers = #tpu.dot_dimension_numbers<[1], [0], [0], [1], [0, 0, 1, 1], [], []>} : vector<16x512xbf16>, vector<512x128xbf16>, vector<16x128xf32> -> vector<16x128xf32>
    %c0_3 = arith.constant 0 : index
    %c0_4 = arith.constant 0 : index
    %3 = vector.load %arg3[%c0_3, %c0_4] : memref<1x128xf32, #tpu.memory_space<vmem>>, vector<1x128xf32>
    %4 = vector.broadcast %3 : vector<1x128xf32> to vector<16x128xf32>
    %5 = arith.addf %2, %4 : vector<16x128xf32>
    %6 = math.tanh %5 : vector<16x128xf32>
    %7 = arith.truncf %6 : vector<16x128xf32> to vector<16x128xbf16>
    %c0_5 = arith.constant 0 : index
    %c0_6 = arith.constant 0 : index
    %8 = vector.load %arg4[%c0_5, %c0_6] : memref<128x128xbf16, #tpu.memory_space<vmem>>, vector<128x128xbf16>
    %cst_7 = arith.constant dense<0.000000e+00> : vector<16x128xf32>
    %9 = tpu.matmul %7, %8, %cst_7 {dimension_numbers = #tpu.dot_dimension_numbers<[1], [0], [0], [1], [0, 0, 1, 1], [], []>} : vector<16x128xbf16>, vector<128x128xbf16>, vector<16x128xf32> -> vector<16x128xf32>
    %c0_8 = arith.constant 0 : index
    %c0_9 = arith.constant 0 : index
    %10 = vector.load %arg5[%c0_8, %c0_9] : memref<1x128xf32, #tpu.memory_space<vmem>>, vector<1x128xf32>
    %11 = vector.broadcast %10 : vector<1x128xf32> to vector<16x128xf32>
    %12 = arith.addf %9, %11 : vector<16x128xf32>
    %13 = math.tanh %12 : vector<16x128xf32>
    %14 = arith.truncf %13 : vector<16x128xf32> to vector<16x128xbf16>
    %c0_10 = arith.constant 0 : index
    %c0_11 = arith.constant 0 : index
    %15 = vector.load %arg6[%c0_10, %c0_11] : memref<128x128xbf16, #tpu.memory_space<vmem>>, vector<128x128xbf16>
    %cst_12 = arith.constant dense<0.000000e+00> : vector<16x128xf32>
    %16 = tpu.matmul %14, %15, %cst_12 {dimension_numbers = #tpu.dot_dimension_numbers<[1], [0], [0], [1], [0, 0, 1, 1], [], []>} : vector<16x128xbf16>, vector<128x128xbf16>, vector<16x128xf32> -> vector<16x128xf32>
    %c0_13 = arith.constant 0 : index
    %c0_14 = arith.constant 0 : index
    %17 = vector.load %arg7[%c0_13, %c0_14] : memref<1x128xf32, #tpu.memory_space<vmem>>, vector<1x128xf32>
    %18 = vector.broadcast %17 : vector<1x128xf32> to vector<16x128xf32>
    %19 = arith.addf %16, %18 : vector<16x128xf32>
    %c0_15 = arith.constant 0 : index
    %c0_16 = arith.constant 0 : index
    %20 = vector.load %arg8[%c0_15, %c0_16] : memref<16x128xf32, #tpu.memory_space<vmem>>, vector<16x128xf32>
    tpu.vector_store %arg8[%c0_15, %c0_16], %19 {strides = array<i32>} : memref<16x128xf32, #tpu.memory_space<vmem>>, vector<16x128xf32>,
    return
  }
  func.func @transform_0(%arg0: i32) -> (i32, i32) {
    %c0_i32 = arith.constant 0 : i32
    %c0_i32_0 = arith.constant 0 : i32
    return %arg0, %c0_i32 : i32, i32
  }
  func.func @transform_1(%arg0: i32) -> (i32, i32) {
    %c0_i32 = arith.constant 0 : i32
    %c0_i32_0 = arith.constant 0 : i32
    %c0_i32_1 = arith.constant 0 : i32
    return %c0_i32, %c0_i32_0 : i32, i32
  }
  func.func @transform_2(%arg0: i32) -> (i32, i32) {
    %c0_i32 = arith.constant 0 : i32
    %c0_i32_0 = arith.constant 0 : i32
    %c0_i32_1 = arith.constant 0 : i32
    return %c0_i32, %c0_i32_0 : i32, i32
  }
  func.func @transform_3(%arg0: i32) -> (i32, i32) {
    %c0_i32 = arith.constant 0 : i32
    %c0_i32_0 = arith.constant 0 : i32
    %c0_i32_1 = arith.constant 0 : i32
    return %c0_i32, %c0_i32_0 : i32, i32
  }
  func.func @transform_4(%arg0: i32) -> (i32, i32) {
    %c0_i32 = arith.constant 0 : i32
    %c0_i32_0 = arith.constant 0 : i32
    %c0_i32_1 = arith.constant 0 : i32
    return %c0_i32, %c0_i32_0 : i32, i32
  }
  func.func @transform_5(%arg0: i32) -> (i32, i32) {
    %c0_i32 = arith.constant 0 : i32
    %c0_i32_0 = arith.constant 0 : i32
    %c0_i32_1 = arith.constant 0 : i32
    return %c0_i32, %c0_i32_0 : i32, i32
  }
  func.func @transform_6(%arg0: i32) -> (i32, i32) {
    %c0_i32 = arith.constant 0 : i32
    %c0_i32_0 = arith.constant 0 : i32
    %c0_i32_1 = arith.constant 0 : i32
    return %c0_i32, %c0_i32_0 : i32, i32
  }
  func.func @transform_7(%arg0: i32) -> (i32, i32) {
    %c0_i32 = arith.constant 0 : i32
    %c0_i32_0 = arith.constant 0 : i32
    return %arg0, %c0_i32 : i32, i32
  }
}

</mosaic_0001>

<bundles_post_ra>
// kernel: lenet_forward.3
= control target key start
LH: loop header
LB: loop body
LE: loop exit
PB: predicated region body
PF: predicated region fallthrough
CT: control target
= control target key end

     0   :  { %s1354_s12 = smov 0   ;;  %s1356_s13 = smov 0   ;;  %s1538_s0 = inlined_call_operand.vmem [shape: bf16[4,416,128], index: 0, kind: input, shape index: {}]   ;;  %s1539_s1 = inlined_call_operand.vmem [shape: bf16[128,128], index: 1, kind: input, shape index: {}]   ;;  %s1540_s2 = inlined_call_operand.vmem [shape: f32[1,128], index: 2, kind: input, shape index: {}]   ;;  %s1541_s3 = inlined_call_operand.vmem [shape: bf16[416,128], index: 3, kind: output, shape index: {}]  }
   0x1   :  { %s1358_s14 = smov 0   ;;  %s1360_s15 = smov 0  }
   0x2   :  { %s1362_s16 = smov 0  }
   0x3 LB: > { %s22_s17 = sadd.s32 1, %s1321_s14  ;;  %s25_s18 = sadd.s32 1, %s1325_s15  ;;  %s1329_s16 = sphi %s1362_s16, %s13_s16   ;;  %s1325_s15 = sphi %s1360_s15, %s1545_s15   ;;  %s1321_s14 = sphi %s1358_s14, %s1544_s14   ;;  %s1317_s13 = sphi %s1356_s13, %s1543_s13   ;;  %s1313_s12 = sphi %s1354_s12, %s1542_s12  }
   0x4   : > { %p23_p0 = scmp.ge.s32.totalorder %s22_s17, 4  ;;  %p911_p1 = scmp.ge.s32.totalorder %s1329_s16, 1 }
   0x5   : > { %p156_p2 = scmp.lt.s32.totalorder %s1329_s16, 9 }
   0x6   : > { %s1547_s17 = smov (%p23_p0, %s22_s17), 0  ;;  %s1549_s18 = smov (!%p23_p0, %s25_s18), %s1325_s15 }
   0x7   : > { %p157_p3 = pnand %p911_p1, %p156_p2  ;;  %p27_p4 = scmp.ge.s32.totalorder %s1549_s18, 2 }
   0x8   : > { %s184_s19 = smul.u32 (!%p157_p3), 26, %s1317_s13  ;;  %p185_p5 = scmp.lt.s32.totalorder (!%p157_p3), %s1313_s12, 3 }
   0x9   : > { %s1551_s18 = smov (%p27_p4, %s1549_s18), 0  ;;  %160 = sbr.rel (%p157_p3) target bundleno = 355 (0x163), region = 32 }
   0xa   : > { %p187_p6 = scmp.lt.s32.totalorder (!%p157_p3), %s184_s19, 51  ;;  %p914_p7 = scmp.ne.s32.totalorder (!%p157_p3), %s1313_s12, 0 }
  0x10   : > { %s186_s20 = scalar_select %p185_p5, %s1313_s12, 3 }
  0x11   : > { %s1553_s19 = smov (!%p187_p6, %s184_s19), 51  ;;  %204 = sbr.rel (%p914_p7) target bundleno = 32 (0x20), region = 36 }
  0x12   : > { %s1174_s21 = smul.u32 52, %s186_s20  ;;  %s913_s23 = sshll.u32 %s1553_s19, 2  ;;  %v1331_v0 = vmov (!%p914_p7), 0.0  }
  0x13   : > { %s1391_s27 = scalar_lea.vmem %s1541_s3, %s913_s23  ;;  %205 = vst [vmem:[#allocation2] sm:$0xff] (!%p914_p7), %v1331_v0  ;;  %206 = vst [vmem:[#allocation2 + $0x8] sm:$0xff] (!%p914_p7), %v1331_v0 }
  0x14   : > { %s190_s22 = sadd.s32 %s1174_s21, %s1553_s19  ;;  %207 = vst [vmem:[#allocation2 + $0x10] sm:$0xff] (!%p914_p7), %v1331_v0  ;;  %208 = vst [vmem:[#allocation2 + $0x18] sm:$0xff] (!%p914_p7), %v1331_v0 }
  0x15   : > { %s912_s24 = sshll.u32 %s190_s22, 2  ;;  %209 = vst [vmem:[#allocation2 + $0x20] sm:$0xff] (!%p914_p7), %v1331_v0  ;;  %210 = vst [vmem:[#allocation2 + $0x28] sm:$0xff] (!%p914_p7), %v1331_v0 }
  0x16   : > { %s1396_s30 = scalar_lea.vmem %s1538_s0, %s912_s24  ;;  %211 = vst [vmem:[#allocation2 + $0x30] sm:$0xff] (!%p914_p7), %v1331_v0  ;;  %212 = vst [vmem:[#allocation2 + $0x38] sm:$0xff] (!%p914_p7), %v1331_v0 }
  0x17   : > { %213 = vst [vmem:[#allocation2 + $0x40] sm:$0xff] (!%p914_p7), %v1331_v0  ;;  %214 = vst [vmem:[#allocation2 + $0x48] sm:$0xff] (!%p914_p7), %v1331_v0 }
  0x18   : > { %215 = vst [vmem:[#allocation2 + $0x50] sm:$0xff] %v1331_v0  ;;  %216 = vst [vmem:[#allocation2 + $0x58] sm:$0xff] %v1331_v0 }
  0x19   : > { %217 = vst [vmem:[#allocation2 + $0x60] sm:$0xff] %v1331_v0  ;;  %218 = vst [vmem:[#allocation2 + $0x68] sm:$0xff] %v1331_v0 }
  0x1a   : > { %219 = vst [vmem:[#allocation2 + $0x70] sm:$0xff] %v1331_v0  ;;  %220 = vst [vmem:[#allocation2 + $0x78] sm:$0xff] %v1331_v0 }
  0x1b   : > { %221 = vst [vmem:[#allocation2 + $0x80] sm:$0xff] %v1331_v0  ;;  %222 = vst [vmem:[#allocation2 + $0x88] sm:$0xff] %v1331_v0 }
  0x1c   : > { %223 = vst [vmem:[#allocation2 + $0x90] sm:$0xff] %v1331_v0  ;;  %224 = vst [vmem:[#allocation2 + $0x98] sm:$0xff] %v1331_v0 }
  0x1d   : > { %225 = vst [vmem:[#allocation2 + $0xa0] sm:$0xff] %v1331_v0  ;;  %226 = vst [vmem:[#allocation2 + $0xa8] sm:$0xff] %v1331_v0 }
  0x1e   : > { %227 = vst [vmem:[#allocation2 + $0xb0] sm:$0xff] %v1331_v0  ;;  %228 = vst [vmem:[#allocation2 + $0xb8] sm:$0xff] %v1331_v0 }
  0x1f   : > { %229 = vst [vmem:[#allocation2 + $0xc0] sm:$0xff] %v1331_v0  ;;  %230 = vst [vmem:[#allocation2 + $0xc8] sm:$0xff] %v1331_v0 }
  0x20 PF: > { %v1218_v1 = vld [vmem:[%s1539_s1] sm:$0xff]   ;;  %v1332_v2 = vmov 0.0   ;;  %v1219_v3 = vld [vmem:[%s1539_s1 + $0x8] sm:$0xff]   ;;  %vm1333_vm0 = vmmov 0   ;;  %v1220_v4 = vld [vmem:[%s1539_s1 + $0x10] sm:$0xff]   ;;  %p937_p8 = scmp.ne.s32.totalorder %s1313_s12, 3 }
  0x21   : > { %1090 = vmatprep.subr.bf16.mxu0 %v1332_v2  ;;  %1158 = vmatprep.subr.bf16.mxu1 %v1332_v2  ;;  %v1221_v5 = vld [vmem:[%s1539_s1 + $0x18] sm:$0xff]   ;;  %v1222_v6 = vld [vmem:[%s1539_s1 + $0x20] sm:$0xff]   ;;  %v1223_v7 = vld [vmem:[%s1539_s1 + $0x28] sm:$0xff]  }
  0x22   : > { %1091 = vmatpush3.bf16.msra.mxu0 %v1218_v1  ;;  %1166 = vmatpush3.bf16.msra.mxu1 %v1218_v1  ;;  %v1224_v8 = vld [vmem:[%s1539_s1 + $0x30] sm:$0xff]   ;;  %v1225_v9 = vld [vmem:[%s1539_s1 + $0x38] sm:$0xff]   ;;  %v1226_v10 = vld [vmem:[%s1396_s30] sm:$0xff]  }
  0x23   : > { %1092 = vmatprep.subr.bf16.mxu0 %v1332_v2  ;;  %1159 = vmatprep.subr.bf16.mxu1 %v1332_v2  ;;  %v1227_v11 = vld [vmem:[%s1396_s30 + $0x38] sm:$0xff]   ;;  %v1228_v12 = vld [vmem:[%s1396_s30 + $0x8] sm:$0xff]   ;;  %v1229_v13 = vld [vmem:[%s1396_s30 + $0x40] sm:$0xff]  }
  0x24   : > { %1106 = vmatprep.mubr.msk.bf16.mxu0 %vm1333_vm0, %v1332_v2  ;;  %1134 = vmatprep.mubr.msk.bf16.mxu1 %vm1333_vm0, %v1332_v2  ;;  %v1230_v14 = vld [vmem:[%s1396_s30 + $0x10] sm:$0xff]   ;;  %v1231_v15 = vld [vmem:[%s1396_s30 + $0x48] sm:$0xff]   ;;  %v1232_v16 = vld [vmem:[%s1396_s30 + $0x18] sm:$0xff]  }
  0x25   : > { %v1233_v17 = vld [vmem:[%s1396_s30 + $0x50] sm:$0xff]   ;;  %v1234_v18 = vld [vmem:[%s1396_s30 + $0x20] sm:$0xff]   ;;  %v1235_v19 = vld [vmem:[%s1396_s30 + $0x58] sm:$0xff]  }
  0x26   : > { %1093 = vmatpush3.bf16.msra.mxu0 %v1219_v3  ;;  %1167 = vmatpush3.bf16.msra.mxu1 %v1219_v3  ;;  %v1236_v20 = vld [vmem:[%s1396_s30 + $0x28] sm:$0xff]   ;;  %v1237_v21 = vld [vmem:[%s1396_s30 + $0x60] sm:$0xff]   ;;  %v1238_v22 = vld [vmem:[%s1396_s30 + $0x30] sm:$0xff]  }
  0x27   : > { %1094 = vmatprep.subr.bf16.mxu0 %v1332_v2  ;;  %1160 = vmatprep.subr.bf16.mxu1 %v1332_v2  ;;  %v1481_v23 = vld [vmem:[%s1540_s2] ss:$0 sm:$0xff]  ;;  %v287_v49 = vld [vmem:[#allocation2 + $0x70] sm:$0xff]  ;;  %v274_v51 = vld [vmem:[#allocation2 + $0x8] sm:$0xff] }
  0x28   : > { %v273_v44 = vld [vmem:[#allocation2] sm:$0xff]  ;;  %v288_v54 = vld [vmem:[#allocation2 + $0x78] sm:$0xff] }
  0x2a   : > { %1095 = vmatpush3.bf16.msra.mxu0 %v1220_v4  ;;  %1168 = vmatpush3.bf16.msra.mxu1 %v1220_v4  ;;  %v275_v4 = vld [vmem:[#allocation2 + $0x10] sm:$0xff] }
  0x2b   : > { %1096 = vmatprep.subr.bf16.mxu0 %v1332_v2  ;;  %1161 = vmatprep.subr.bf16.mxu1 %v1332_v2 }
  0x2e   : > { %1097 = vmatpush3.bf16.msra.mxu0 %v1221_v5  ;;  %1169 = vmatpush3.bf16.msra.mxu1 %v1221_v5 }
  0x2f   : > { %1098 = vmatprep.subr.bf16.mxu0 %v1332_v2  ;;  %1162 = vmatprep.subr.bf16.mxu1 %v1332_v2 }
  0x32   : > { %1099 = vmatpush3.bf16.msra.mxu0 %v1222_v6  ;;  %1170 = vmatpush3.bf16.msra.mxu1 %v1222_v6 }
  0x33   : > { %1100 = vmatprep.subr.bf16.mxu0 %v1332_v2  ;;  %1163 = vmatprep.subr.bf16.mxu1 %v1332_v2 }
  0x36   : > { %1101 = vmatpush3.bf16.msra.mxu0 %v1223_v7  ;;  %1171 = vmatpush3.bf16.msra.mxu1 %v1223_v7 }
  0x37   : > { %1102 = vmatprep.subr.bf16.mxu0 %v1332_v2  ;;  %1164 = vmatprep.subr.bf16.mxu1 %v1332_v2 }
  0x3a   : > { %1103 = vmatpush3.bf16.msra.mxu0 %v1224_v8  ;;  %1172 = vmatpush3.bf16.msra.mxu1 %v1224_v8 }
  0x3b   : > { %1104 = vmatprep.subr.bf16.mxu0 %v1332_v2  ;;  %1165 = vmatprep.subr.bf16.mxu1 %v1332_v2 }
  0x3e   : > { %1105 = vmatpush3.bf16.msra.mxu0 %v1225_v9  ;;  %1173 = vmatpush3.bf16.msra.mxu1 %v1225_v9  ;;  %v289_v9 = vld [vmem:[#allocation2 + $0x80] sm:$0xff] }
  0x41   : > { %1107 = vmatmul.mubr.bf16.vlgmr.msra.gmra.mrb[0].mxu0 %v1226_v10  ;;  %1135 = vmatmul.mubr.bf16.vlgmr.msra.gmra.mrb[0].mxu1 %v1227_v11  ;;  %v276_v11 = vld [vmem:[#allocation2 + $0x18] sm:$0xff] }
  0x42   : > { %1110 = vmatprep.mubr.msk.bf16.mxu0 %vm1333_vm0, %v1332_v2  ;;  %1138 = vmatprep.mubr.msk.bf16.mxu1 %vm1333_vm0, %v1332_v2 }
  0x49   : > { %1111 = vmatmul.mubr.bf16.gmra.mrb[4].mxu0 %v1228_v12  ;;  %1139 = vmatmul.mubr.bf16.gmra.mrb[4].mxu1 %v1229_v13 }
  0x4a   : > { %1114 = vmatprep.mubr.msk.bf16.mxu0 %vm1333_vm0, %v1332_v2  ;;  %1142 = vmatprep.mubr.msk.bf16.mxu1 %vm1333_vm0, %v1332_v2 }
  0x51   : > { %1115 = vmatmul.mubr.bf16.gmra.mrb[8].mxu0 %v1230_v14  ;;  %1143 = vmatmul.mubr.bf16.gmra.mrb[8].mxu1 %v1231_v15  ;;  %v290_v14 = vld [vmem:[#allocation2 + $0x88] sm:$0xff] }
  0x52   : > { %1118 = vmatprep.mubr.msk.bf16.mxu0 %vm1333_vm0, %v1332_v2  ;;  %1146 = vmatprep.mubr.msk.bf16.mxu1 %vm1333_vm0, %v1332_v2 }
  0x59   : > { %1119 = vmatmul.mubr.bf16.gmra.mrb[12].mxu0 %v1232_v16  ;;  %1147 = vmatmul.mubr.bf16.gmra.mrb[12].mxu1 %v1233_v17 }
  0x5a   : > { %1122 = vmatprep.mubr.msk.bf16.mxu0 %vm1333_vm0, %v1332_v2  ;;  %1150 = vmatprep.mubr.msk.bf16.mxu1 %vm1333_vm0, %v1332_v2 }
  0x61   : > { %1123 = vmatmul.mubr.bf16.gmra.mrb[16].mxu0 %v1234_v18  ;;  %1151 = vmatmul.mubr.bf16.gmra.mrb[16].mxu1 %v1235_v19 }
  0x62   : > { %1126 = vmatprep.mubr.msk.bf16.mxu0 %vm1333_vm0, %v1332_v2  ;;  %1154 = vmatprep.mubr.msk.bf16.mxu1 %vm1333_vm0, %v1332_v2 }
  0x69   : > { %1127 = vmatmul.mubr.bf16.gmra.mrb[20].mxu0 %v1236_v20  ;;  %1155 = vmatmul.mubr.bf16.gmra.mrb[20].mxu1 %v1237_v21 }
  0x6a   : > { %1130 = vmatprep.mubr.msk.bf16.mxu0 %vm1333_vm0, %v1332_v2 }
  0x71   : > { %1131 = vmatmul.mubr.bf16.gmra.mrb[24].mxu0 %v1238_v22 }
 0x114   : > { %v466_v24 = vpop.f32.mrb[0].mxu0  ;;  %v522_v25 = vpop.f32.mrb[0].mxu1 }
 0x115   : > { %v467_v26 = vadd.f32 %v1481_v23, %v466_v24  ;;  %v1108_v27 = vpop.f32.mrb[1].mxu0  ;;  %v523_v28 = vadd.f32 %v1481_v23, %v522_v25  ;;  %v1136_v29 = vpop.f32.mrb[1].mxu1 }
 0x116   : > { %v469_v30 = vpop.f32.mrb[2].mxu0  ;;  %v525_v31 = vpop.f32.mrb[2].mxu1  ;;  %v277_v29 = vld [vmem:[#allocation2 + $0x20] sm:$0xff] }
 0x117   : > { %1239 = vtanh.f32 %v467_v26  ;;  %v470_v32 = vadd.f32 %v1481_v23, %v469_v30  ;;  %v1109_v33 = vpop.f32.mrb[3].mxu0  ;;  %v526_v34 = vadd.f32 %v1481_v23, %v525_v31  ;;  %v1137_v35 = vpop.f32.mrb[3].mxu1 }
 0x118   : > { %1241 = vtanh.f32 %v523_v28 }
 0x119   : > { %1243 = vtanh.f32 %v470_v32 }
 0x11a   : > { %1245 = vtanh.f32 %v526_v34  ;;  %v291_v34 = vld [vmem:[#allocation2 + $0x90] sm:$0xff] }
 0x11c   : > { %v474_v36 = vpop.f32.mrb[4].mxu0  ;;  %v530_v37 = vpop.f32.mrb[4].mxu1 }
 0x11d   : > { %v475_v38 = vadd.f32 %v1481_v23, %v474_v36  ;;  %v1112_v39 = vpop.f32.mrb[5].mxu0  ;;  %v531_v40 = vadd.f32 %v1481_v23, %v530_v37  ;;  %v1140_v41 = vpop.f32.mrb[5].mxu1  ;;  %v278_v36 = vld [vmem:[#allocation2 + $0x28] sm:$0xff] }
 0x11e   : > { %v477_v42 = vpop.f32.mrb[6].mxu0  ;;  %v533_v43 = vpop.f32.mrb[6].mxu1  ;;  %v292_v39 = vld [vmem:[#allocation2 + $0x98] sm:$0xff] }
 0x11f   : > { %1247 = vtanh.f32 %v475_v38  ;;  %v478_v45 = vadd.f32 %v1481_v23, %v477_v42  ;;  %v1113_v46 = vpop.f32.mrb[7].mxu0  ;;  %v534_v47 = vadd.f32 %v1481_v23, %v533_v43  ;;  %v1141_v48 = vpop.f32.mrb[7].mxu1 }
 0x120   : > { %1249 = vtanh.f32 %v531_v40 }
 0x121   : > { %v1240_v50 = vpop.eup %1239  ;;  %1251 = vtanh.f32 %v478_v45 }
 0x122   : > { %v1242_v52 = vpop.eup %1241  ;;  %v595_v53 = vadd.f32 %v1240_v50, %v273_v44  ;;  %1253 = vtanh.f32 %v534_v47 }
 0x123   : > { %v1244_v55 = vpop.eup %1243  ;;  %v609_v56 = vadd.f32 %v1242_v52, %v287_v49 }
 0x124   : > { %v1246_v57 = vpop.eup %1245  ;;  %621 = vst [vmem:[#allocation2] sm:$0xff] %v595_v53  ;;  %v596_v58 = vadd.f32 %v1244_v55, %v274_v51  ;;  %v482_v59 = vpop.f32.mrb[8].mxu0  ;;  %v279_v53 = vld [vmem:[#allocation2 + $0x30] sm:$0xff] }
 0x125   : > { %v538_v60 = vpop.f32.mrb[8].mxu1  ;;  %635 = vst [vmem:[#allocation2 + $0x70] sm:$0xff] %v609_v56  ;;  %v610_v61 = vadd.f32 %v1246_v57, %v288_v54  ;;  %v483_v62 = vadd.f32 %v1481_v23, %v482_v59  ;;  %v1116_v63 = vpop.f32.mrb[9].mxu0 }
 0x126   : > { %v539_v0 = vadd.f32 %v1481_v23, %v538_v60  ;;  %v1144_v1 = vpop.f32.mrb[9].mxu1  ;;  %622 = vst [vmem:[#allocation2 + $0x8] sm:$0xff] %v596_v58  ;;  %v485_v2 = vpop.f32.mrb[10].mxu0  ;;  %v293_v58 = vld [vmem:[#allocation2 + $0xa0] sm:$0xff]  ;;  %v280_v60 = vld [vmem:[#allocation2 + $0x38] sm:$0xff]  ;;  %v294_v63 = vld [vmem:[#allocation2 + $0xa8] sm:$0xff] }
 0x127   : > { %v541_v3 = vpop.f32.mrb[10].mxu1  ;;  %636 = vst [vmem:[#allocation2 + $0x78] sm:$0xff] %v610_v61  ;;  %1255 = vtanh.f32 %v483_v62  ;;  %v486_v5 = vadd.f32 %v1481_v23, %v485_v2  ;;  %v1117_v6 = vpop.f32.mrb[11].mxu0 }
 0x128   : > { %v542_v7 = vadd.f32 %v1481_v23, %v541_v3  ;;  %v1145_v8 = vpop.f32.mrb[11].mxu1  ;;  %1257 = vtanh.f32 %v539_v0 }
 0x129   : > { %v1248_v10 = vpop.eup %1247  ;;  %1259 = vtanh.f32 %v486_v5 }
 0x12a   : > { %v1250_v12 = vpop.eup %1249  ;;  %v597_v13 = vadd.f32 %v1248_v10, %v275_v4  ;;  %1261 = vtanh.f32 %v542_v7 }
 0x12b   : > { %v1252_v15 = vpop.eup %1251  ;;  %v611_v16 = vadd.f32 %v1250_v12, %v289_v9 }
 0x12c   : > { %v1254_v17 = vpop.eup %1253  ;;  %623 = vst [vmem:[#allocation2 + $0x10] sm:$0xff] %v597_v13  ;;  %v598_v18 = vadd.f32 %v1252_v15, %v276_v11  ;;  %v490_v19 = vpop.f32.mrb[12].mxu0  ;;  %v281_v13 = vld [vmem:[#allocation2 + $0x40] sm:$0xff] }
 0x12d   : > { %v546_v20 = vpop.f32.mrb[12].mxu1  ;;  %637 = vst [vmem:[#allocation2 + $0x80] sm:$0xff] %v611_v16  ;;  %v612_v21 = vadd.f32 %v1254_v17, %v290_v14  ;;  %v491_v22 = vadd.f32 %v1481_v23, %v490_v19  ;;  %v1120_v24 = vpop.f32.mrb[13].mxu0 }
 0x12e   : > { %v547_v25 = vadd.f32 %v1481_v23, %v546_v20  ;;  %v1148_v26 = vpop.f32.mrb[13].mxu1  ;;  %624 = vst [vmem:[#allocation2 + $0x18] sm:$0xff] %v598_v18  ;;  %v493_v27 = vpop.f32.mrb[14].mxu0  ;;  %v295_v18 = vld [vmem:[#allocation2 + $0xb0] sm:$0xff]  ;;  %v282_v20 = vld [vmem:[#allocation2 + $0x48] sm:$0xff]  ;;  %v296_v24 = vld [vmem:[#allocation2 + $0xb8] sm:$0xff] }
 0x12f   : > { %v549_v28 = vpop.f32.mrb[14].mxu1  ;;  %638 = vst [vmem:[#allocation2 + $0x88] sm:$0xff] %v612_v21  ;;  %1263 = vtanh.f32 %v491_v22  ;;  %v494_v30 = vadd.f32 %v1481_v23, %v493_v27  ;;  %v1121_v31 = vpop.f32.mrb[15].mxu0 }
 0x130   : > { %v550_v32 = vadd.f32 %v1481_v23, %v549_v28  ;;  %v1149_v33 = vpop.f32.mrb[15].mxu1  ;;  %1265 = vtanh.f32 %v547_v25 }
 0x131   : > { %v1256_v35 = vpop.eup %1255  ;;  %1267 = vtanh.f32 %v494_v30 }
 0x132   : > { %v1258_v37 = vpop.eup %1257  ;;  %v599_v38 = vadd.f32 %v1256_v35, %v277_v29  ;;  %1269 = vtanh.f32 %v550_v32 }
 0x133   : > { %v1260_v40 = vpop.eup %1259  ;;  %v613_v41 = vadd.f32 %v1258_v37, %v291_v34  ;;  %v283_v34 = vld [vmem:[#allocation2 + $0x50] sm:$0xff]  ;;  %v297_v37 = vld [vmem:[#allocation2 + $0xc0] sm:$0xff] }
 0x134   : > { %v1262_v42 = vpop.eup %1261  ;;  %625 = vst [vmem:[#allocation2 + $0x20] sm:$0xff] %v599_v38  ;;  %v600_v43 = vadd.f32 %v1260_v40, %v278_v36  ;;  %v498_v44 = vpop.f32.mrb[16].mxu0 }
 0x135   : > { %v554_v45 = vpop.f32.mrb[16].mxu1  ;;  %639 = vst [vmem:[#allocation2 + $0x90] sm:$0xff] %v613_v41  ;;  %v614_v46 = vadd.f32 %v1262_v42, %v292_v39  ;;  %v499_v47 = vadd.f32 %v1481_v23, %v498_v44  ;;  %v1124_v48 = vpop.f32.mrb[17].mxu0  ;;  %v284_v39 = vld [vmem:[#allocation2 + $0x58] sm:$0xff]  ;;  %v298_v42 = vld [vmem:[#allocation2 + $0xc8] sm:$0xff] }
 0x136   : > { %v555_v49 = vadd.f32 %v1481_v23, %v554_v45  ;;  %v1152_v50 = vpop.f32.mrb[17].mxu1  ;;  %626 = vst [vmem:[#allocation2 + $0x28] sm:$0xff] %v600_v43  ;;  %v501_v51 = vpop.f32.mrb[18].mxu0  ;;  %v285_v48 = vld [vmem:[#allocation2 + $0x60] sm:$0xff] }
 0x137   : > { %v557_v52 = vpop.f32.mrb[18].mxu1  ;;  %640 = vst [vmem:[#allocation2 + $0x98] sm:$0xff] %v614_v46  ;;  %1271 = vtanh.f32 %v499_v47  ;;  %v502_v54 = vadd.f32 %v1481_v23, %v501_v51  ;;  %v1125_v55 = vpop.f32.mrb[19].mxu0 }
 0x138   : > { %v558_v56 = vadd.f32 %v1481_v23, %v557_v52  ;;  %v1153_v57 = vpop.f32.mrb[19].mxu1  ;;  %1273 = vtanh.f32 %v555_v49  ;;  %v653_v55 = vld [vmem:[#allocation2 + $0x10] sm:$0xff] (!%p937_p8) }
 0x139   : > { %v1264_v59 = vpop.eup %1263  ;;  %1275 = vtanh.f32 %v502_v54  ;;  %v652_v54 = vld [vmem:[#allocation2 + $0x8] sm:$0xff] (!%p937_p8) }
 0x13a   : > { %v1266_v61 = vpop.eup %1265  ;;  %v601_v62 = vadd.f32 %v1264_v59, %v279_v53  ;;  %1277 = vtanh.f32 %v558_v56  ;;  %v651_v53 = vld [vmem:[#allocation2] sm:$0xff] (!%p937_p8)  ;;  %v678_v57 = vmul.f32 (!%p937_p8), 0.25, %v652_v54  ;;  %v679_v59 = vmul.f32 (!%p937_p8), 0.25, %v653_v55 }
 0x13b   : > { %v1268_v0 = vpop.eup %1267  ;;  %v615_v1 = vadd.f32 %v1266_v61, %v293_v58  ;;  %v677_v56 = vmul.f32 (!%p937_p8), 0.25, %v651_v53  ;;  %v654_v58 = vld [vmem:[#allocation2 + $0x18] sm:$0xff] (!%p937_p8) }
 0x13c   : > { %v1270_v2 = vpop.eup %1269  ;;  %627 = vst [vmem:[#allocation2 + $0x30] sm:$0xff] %v601_v62  ;;  %v602_v3 = vadd.f32 %v1268_v0, %v280_v60  ;;  %v506_v4 = vpop.f32.mrb[20].mxu0  ;;  %v655_v60 = vld [vmem:[#allocation2 + $0x20] sm:$0xff] (!%p937_p8)  ;;  %v680_v62 = vmul.f32 (!%p937_p8), 0.25, %v654_v58 }
 0x13d   : > { %v562_v5 = vpop.f32.mrb[20].mxu1  ;;  %641 = vst [vmem:[#allocation2 + $0xa0] sm:$0xff] %v615_v1  ;;  %v616_v6 = vadd.f32 %v1270_v2, %v294_v63  ;;  %v507_v7 = vadd.f32 %v1481_v23, %v506_v4  ;;  %v1128_v8 = vpop.f32.mrb[21].mxu0  ;;  %v656_v61 = vld [vmem:[#allocation2 + $0x28] sm:$0xff] (!%p937_p8)  ;;  %v681_v63 = vmul.f32 (!%p937_p8), 0.25, %v655_v60  ;;  %v995_v4 = vpack.c.bf16 (!%p937_p8), %v678_v57, %v677_v56 }
 0x13e   : > { %v563_v9 = vadd.f32 %v1481_v23, %v562_v5  ;;  %v1156_v10 = vpop.f32.mrb[21].mxu1  ;;  %628 = vst [vmem:[#allocation2 + $0x38] sm:$0xff] %v602_v3  ;;  %v509_v11 = vpop.f32.mrb[22].mxu0  ;;  %v682_v0 = vmul.f32 (!%p937_p8), 0.25, %v656_v61 }
 0x13f   : > { %v565_v12 = vpop.f32.mrb[22].mxu1  ;;  %642 = vst [vmem:[#allocation2 + $0xa8] sm:$0xff] %v616_v6  ;;  %1279 = vtanh.f32 %v507_v7  ;;  %v510_v14 = vadd.f32 %v1481_v23, %v509_v11  ;;  %v1129_v15 = vpop.f32.mrb[23].mxu0  ;;  %v1000_v11 = vpack.c.bf16 (!%p937_p8), %v680_v62, %v679_v59  ;;  %996 = vst [vmem:[%s1391_s27] sm:$0xff] (!%p937_p8), %v995_v4  }
 0x140   : > { %v566_v16 = vadd.f32 %v1481_v23, %v565_v12  ;;  %v1157_v17 = vpop.f32.mrb[23].mxu1  ;;  %1281 = vtanh.f32 %v563_v9  ;;  %v1005_v12 = vpack.c.bf16 (!%p937_p8), %v682_v0, %v681_v63 }
 0x141   : > { %v1272_v19 = vpop.eup %1271  ;;  %1283 = vtanh.f32 %v510_v14  ;;  %v665_v17 = vld [vmem:[#allocation2 + $0x70] sm:$0xff] (!%p937_p8)  ;;  %1057 = vst [vmem:[%s1391_s27 + $0x8] sm:$0xff] (!%p937_p8), %v1000_v11  }
 0x142   : > { %v1274_v21 = vpop.eup %1273  ;;  %v603_v22 = vadd.f32 %v1272_v19, %v281_v13  ;;  %1285 = vtanh.f32 %v566_v16  ;;  %1058 = vst [vmem:[%s1391_s27 + $0x10] sm:$0xff] (!%p937_p8), %v1005_v12  }
 0x143   : > { %v1276_v25 = vpop.eup %1275  ;;  %v617_v26 = vadd.f32 %v1274_v21, %v295_v18  ;;  %v657_v1 = vld [vmem:[#allocation2 + $0x30] sm:$0xff] (!%p937_p8) }
 0x144   : > { %v1278_v27 = vpop.eup %1277  ;;  %629 = vst [vmem:[#allocation2 + $0x40] sm:$0xff] %v603_v22  ;;  %v604_v28 = vadd.f32 %v1276_v25, %v282_v20  ;;  %v514_v29 = vpop.f32.mrb[24].mxu0  ;;  %v683_v5 = vmul.f32 (!%p937_p8), 0.25, %v657_v1  ;;  %v666_v22 = vld [vmem:[#allocation2 + $0x78] sm:$0xff] (!%p937_p8)  ;;  %v668_v25 = vld [vmem:[#allocation2 + $0x88] sm:$0xff] (!%p937_p8) }
 0x145   : > { %643 = vst [vmem:[#allocation2 + $0xb0] sm:$0xff] %v617_v26  ;;  %v618_v30 = vadd.f32 %v1278_v27, %v296_v24  ;;  %v515_v31 = vadd.f32 %v1481_v23, %v514_v29  ;;  %v1132_v32 = vpop.f32.mrb[25].mxu0  ;;  %v658_v2 = vld [vmem:[#allocation2 + $0x38] sm:$0xff] (!%p937_p8)  ;;  %v667_v24 = vld [vmem:[#allocation2 + $0x80] sm:$0xff] (!%p937_p8)  ;;  %v691_v27 = vmul.f32 (!%p937_p8), 0.25, %v665_v17 }
 0x146   : > { %630 = vst [vmem:[#allocation2 + $0x48] sm:$0xff] %v604_v28  ;;  %v517_v33 = vpop.f32.mrb[26].mxu0  ;;  %v684_v6 = vmul.f32 (!%p937_p8), 0.25, %v658_v2  ;;  %v692_v28 = vmul.f32 (!%p937_p8), 0.25, %v666_v22  ;;  %v693_v29 = vmul.f32 (!%p937_p8), 0.25, %v667_v24  ;;  %v671_v32 = vld [vmem:[#allocation2 + $0xa0] sm:$0xff] (!%p937_p8) }
 0x147   : > { %644 = vst [vmem:[#allocation2 + $0xb8] sm:$0xff] %v618_v30  ;;  %1287 = vtanh.f32 %v515_v31  ;;  %v518_v35 = vadd.f32 %v1481_v23, %v517_v33  ;;  %v1133_v36 = vpop.f32.mrb[27].mxu0  ;;  %v286_v23 = vld [vmem:[#allocation2 + $0x68] sm:$0xff]  ;;  %v669_v30 = vld [vmem:[#allocation2 + $0x90] sm:$0xff] (!%p937_p8)  ;;  %v670_v31 = vld [vmem:[#allocation2 + $0x98] sm:$0xff] (!%p937_p8) }
 0x148   : > { %v1010_v18 = vpack.c.bf16 (!%p937_p8), %v684_v6, %v683_v5  ;;  %v695_v36 = vmul.f32 (!%p937_p8), 0.25, %v669_v30 }
 0x149   : > { %v1280_v38 = vpop.eup %1279  ;;  %1289 = vtanh.f32 %v518_v35  ;;  %v694_v35 = vmul.f32 (!%p937_p8), 0.25, %v668_v25 }
 0x14a   : > { %v1282_v40 = vpop.eup %1281  ;;  %v605_v41 = vadd.f32 %v1280_v38, %v283_v34  ;;  %1059 = vst [vmem:[%s1391_s27 + $0x18] sm:$0xff] (!%p937_p8), %v1010_v18  }
 0x14b   : > { %v1284_v43 = vpop.eup %1283  ;;  %v619_v44 = vadd.f32 %v1282_v40, %v297_v37  ;;  %v659_v3 = vld [vmem:[#allocation2 + $0x40] sm:$0xff] (!%p937_p8)  ;;  %v672_v37 = vld [vmem:[#allocation2 + $0xa8] sm:$0xff] (!%p937_p8)  ;;  %v1030_v40 = vpack.c.bf16 (!%p937_p8), %v692_v28, %v691_v27 }
 0x14c   : > { %v1286_v45 = vpop.eup %1285  ;;  %631 = vst [vmem:[#allocation2 + $0x50] sm:$0xff] %v605_v41  ;;  %v606_v46 = vadd.f32 %v1284_v43, %v284_v39  ;;  %v685_v8 = vmul.f32 (!%p937_p8), 0.25, %v659_v3  ;;  %v673_v38 = vld [vmem:[#allocation2 + $0xb0] sm:$0xff] (!%p937_p8)  ;;  %v696_v41 = vmul.f32 (!%p937_p8), 0.25, %v670_v31  ;;  %v698_v43 = vmul.f32 (!%p937_p8), 0.25, %v672_v37 }
 0x14d   : > { %645 = vst [vmem:[#allocation2 + $0xc0] sm:$0xff] %v619_v44  ;;  %v620_v47 = vadd.f32 %v1286_v45, %v298_v42  ;;  %v660_v7 = vld [vmem:[#allocation2 + $0x48] sm:$0xff] (!%p937_p8)  ;;  %v697_v42 = vmul.f32 (!%p937_p8), 0.25, %v671_v32  ;;  %1063 = vst [vmem:[%s1391_s27 + $0x38] sm:$0xff] (!%p937_p8), %v1030_v40  }
 0x14e   : > { %632 = vst [vmem:[#allocation2 + $0x58] sm:$0xff] %v606_v46  ;;  %v686_v13 = vmul.f32 (!%p937_p8), 0.25, %v660_v7  ;;  %v674_v39 = vld [vmem:[#allocation2 + $0xb8] sm:$0xff] (!%p937_p8)  ;;  %v1035_v46 = vpack.c.bf16 (!%p937_p8), %v694_v35, %v693_v29 }
 0x14f   : > { %646 = vst [vmem:[#allocation2 + $0xc8] sm:$0xff] %v620_v47  ;;  %v699_v47 = vmul.f32 (!%p937_p8), 0.25, %v673_v38 }
 0x150   : > { %650 = sbr.rel (%p937_p8) target bundleno = 355 (0x163), region = 40  ;;  %v1015_v26 = vpack.c.bf16 (!%p937_p8), %v686_v13, %v685_v8  ;;  %1064 = vst [vmem:[%s1391_s27 + $0x40] sm:$0xff] (!%p937_p8), %v1035_v46  }
 0x151   : > { %v1288_v49 = vpop.eup %1287 }
 0x152   : > { %v607_v50 = vadd.f32 %v1288_v49, %v285_v48  ;;  %1060 = vst [vmem:[%s1391_s27 + $0x20] sm:$0xff] (!%p937_p8), %v1015_v26   ;;  %v700_v48 = vmul.f32 (!%p937_p8), 0.25, %v674_v39 }
 0x153   : > { %v1290_v51 = vpop.eup %1289  ;;  %v661_v9 = vld [vmem:[#allocation2 + $0x50] sm:$0xff] (!%p937_p8) }
 0x154   : > { %633 = vst [vmem:[#allocation2 + $0x60] sm:$0xff] %v607_v50  ;;  %v608_v52 = vadd.f32 %v1290_v51, %v286_v23  ;;  %v687_v14 = vmul.f32 (!%p937_p8), 0.25, %v661_v9  ;;  %v675_v44 = vld [vmem:[#allocation2 + $0xc0] sm:$0xff] (!%p937_p8)  ;;  %v1040_v23 = vpack.c.bf16 (!%p937_p8), %v696_v41, %v695_v36  ;;  %v1045_v50 = vpack.c.bf16 (!%p937_p8), %v698_v43, %v697_v42 }
 0x155   : > { %v662_v10 = vld [vmem:[#allocation2 + $0x58] sm:$0xff] (!%p937_p8)  ;;  %v701_v49 = vmul.f32 (!%p937_p8), 0.25, %v675_v44 }
 0x156   : > { %634 = vst [vmem:[#allocation2 + $0x68] sm:$0xff] %v608_v52  ;;  %v688_v19 = vmul.f32 (!%p937_p8), 0.25, %v662_v10  ;;  %v676_v45 = vld [vmem:[#allocation2 + $0xc8] sm:$0xff] (!%p937_p8)  ;;  %v1050_v52 = vpack.c.bf16 (!%p937_p8), %v700_v48, %v699_v47  ;;  %1065 = vst [vmem:[%s1391_s27 + $0x48] sm:$0xff] (!%p937_p8), %v1040_v23  }
 0x157   : > { %v702_v51 = vmul.f32 0.25, %v676_v45  ;;  %1066 = vst [vmem:[%s1391_s27 + $0x50] sm:$0xff] %v1045_v50  }
 0x158   : > { %v1020_v33 = vpack.c.bf16 %v688_v19, %v687_v14  ;;  %1067 = vst [vmem:[%s1391_s27 + $0x58] sm:$0xff] %v1050_v52  }
 0x159   : > { %v1055_v53 = vpack.c.bf16 %v702_v51, %v701_v49 }
 0x15a   : > { %1061 = vst [vmem:[%s1391_s27 + $0x28] sm:$0xff] %v1020_v33  }
 0x15b   : > { %v663_v15 = vld [vmem:[#allocation2 + $0x60] sm:$0xff]  ;;  %1068 = vst [vmem:[%s1391_s27 + $0x60] sm:$0xff] %v1055_v53  }
 0x15c   : > { %v689_v20 = vmul.f32 0.25, %v663_v15 }
 0x15d   : > { %v664_v16 = vld [vmem:[#allocation2 + $0x68] sm:$0xff] }
 0x15e   : > { %v690_v21 = vmul.f32 0.25, %v664_v16 }
 0x160   : > { %v1025_v34 = vpack.c.bf16 %v690_v21, %v689_v20 }
 0x162   : > { %1062 = vst [vmem:[%s1391_s27 + $0x30] sm:$0xff] %v1025_v34  }
 0x163 PF: > { %s13_s16 = sadd.s32 1, %s1329_s16   ;;  %s1542_s12 = smov %s1321_s14 }
 0x164   : > { %p10_p9 = scmp.ge.s32.totalorder %s13_s16, 10   ;;  %s1543_s13 = smov %s1325_s15 }
 0x165   : > { %s1544_s14 = smov %s1547_s17  ;;  %s1545_s15 = smov %s1551_s18 }
 0x166   :  { %12 = sbr.rel (!%p10_p9) target bundleno = 3 (0x3), region = 70 }

// kernel: lenet_forward.4
= control target key start
LH: loop header
LB: loop body
LE: loop exit
PB: predicated region body
PF: predicated region fallthrough
CT: control target
= control target key end

     0   :  { %s874_s12 = smov 0   ;;  %s876_s13 = smov 0   ;;  %s983_s0 = inlined_call_operand.vmem [shape: bf16[4,64,256], index: 0, kind: input, shape index: {}]   ;;  %s984_s1 = inlined_call_operand.vmem [shape: bf16[256,128], index: 1, kind: input, shape index: {}]   ;;  %s985_s2 = inlined_call_operand.vmem [shape: f32[1,128], index: 2, kind: input, shape index: {}]   ;;  %s986_s3 = inlined_call_operand.vmem [shape: bf16[64,128], index: 3, kind: output, shape index: {}]  }
   0x1   :  { %s878_s14 = smov 0  }
   0x2 LB: > { %s22_s15 = sadd.s32 1, %s847_s13  ;;  %p630_p0 = scmp.ge.s32.totalorder %s851_s14, 1  ;;  %s851_s14 = sphi %s878_s14, %s13_s14   ;;  %s847_s13 = sphi %s876_s13, %s988_s13   ;;  %s843_s12 = sphi %s874_s12, %s987_s12  }
   0x3   : > { %p23_p1 = scmp.ge.s32.totalorder %s22_s15, 4  ;;  %p157_p2 = scmp.lt.s32.totalorder %s851_s14, 5 }
   0x5   : > { %s990_s15 = smov (%p23_p1, %s22_s15), 0  ;;  %p158_p3 = pnand %p630_p0, %p157_p2 }
   0x6   : > { %p187_p4 = scmp.lt.s32.totalorder (!%p158_p3), %s843_s12, 3  ;;  %p633_p5 = scmp.ne.s32.totalorder (!%p158_p3), %s843_s12, 0 }
   0x7   : > { %161 = sbr.rel (%p158_p3) target bundleno = 309 (0x135), region = 32 }
   0xe   : > { %s188_s16 = scalar_select %p187_p4, %s843_s12, 3 }
   0xf   : > { %207 = sbr.rel (%p633_p5) target bundleno = 22 (0x16), region = 36  ;;  %v853_v0 = vmov (!%p633_p5), 0.0  }
  0x10   : > { %s672_s17 = sshll.u32 %s188_s16, 6  ;;  %208 = vst [vmem:[#allocation2] sm:$0xff] (!%p633_p5), %v853_v0  ;;  %209 = vst [vmem:[#allocation2 + $0x8] sm:$0xff] (!%p633_p5), %v853_v0 }
  0x11   : > { %s899_s20 = scalar_lea.vmem %s983_s0, %s672_s17  ;;  %210 = vst [vmem:[#allocation2 + $0x10] sm:$0xff] (!%p633_p5), %v853_v0  ;;  %211 = vst [vmem:[#allocation2 + $0x18] sm:$0xff] (!%p633_p5), %v853_v0 }
  0x12   : > { %212 = vst [vmem:[#allocation2 + $0x20] sm:$0xff] (!%p633_p5), %v853_v0  ;;  %213 = vst [vmem:[#allocation2 + $0x28] sm:$0xff] (!%p633_p5), %v853_v0 }
  0x13   : > { %214 = vst [vmem:[#allocation2 + $0x30] sm:$0xff] (!%p633_p5), %v853_v0  ;;  %215 = vst [vmem:[#allocation2 + $0x38] sm:$0xff] (!%p633_p5), %v853_v0 }
  0x16 PF: > { %v785_v1 = vld [vmem:[%s984_s1 + $0x40] sm:$0xff]   ;;  %v787_v3 = vld [vmem:[%s984_s1 + $0x48] sm:$0xff]   ;;  %v789_v5 = vld [vmem:[%s984_s1 + $0x50] sm:$0xff]   ;;  %p659_p6 = scmp.ne.s32.totalorder %s843_s12, 3 }
  0x17   : > { %v786_v2 = vld [vmem:[%s984_s1] sm:$0xff]   ;;  %704 = vmatprep.subr.bf16.mxu0 %v785_v1  ;;  %744 = vmatprep.subr.bf16.mxu1 %v785_v1  ;;  %v788_v4 = vld [vmem:[%s984_s1 + $0x8] sm:$0xff]   ;;  %v790_v6 = vld [vmem:[%s984_s1 + $0x10] sm:$0xff]  }
  0x18   : > { %705 = vmatpush3.bf16.msra.mxu0 %v786_v2  ;;  %752 = vmatpush3.bf16.msra.mxu1 %v786_v2  ;;  %v791_v7 = vld [vmem:[%s984_s1 + $0x58] sm:$0xff]   ;;  %v793_v9 = vld [vmem:[%s984_s1 + $0x60] sm:$0xff]   ;;  %v795_v11 = vld [vmem:[%s984_s1 + $0x68] sm:$0xff]  }
  0x19   : > { %706 = vmatprep.subr.bf16.mxu0 %v787_v3  ;;  %745 = vmatprep.subr.bf16.mxu1 %v787_v3  ;;  %v792_v8 = vld [vmem:[%s984_s1 + $0x18] sm:$0xff]   ;;  %v794_v10 = vld [vmem:[%s984_s1 + $0x20] sm:$0xff]   ;;  %v796_v14 = vld [vmem:[%s984_s1 + $0x28] sm:$0xff]  }
  0x1a   : > { %v803_v12 = vld [vmem:[%s899_s20 + $0x4] ss:$8 sps:$4 sm:$0xff]   ;;  %v797_v15 = vld [vmem:[%s984_s1 + $0x70] sm:$0xff]   ;;  %v799_v17 = vld [vmem:[%s984_s1 + $0x78] sm:$0xff]  }
  0x1b   : > { %v806_v13 = vld [vmem:[%s899_s20 + $0x24] ss:$8 sps:$4 sm:$0xff]   ;;  %439 = vmatprep.mubr.bf16.mxu0 %v803_v12  ;;  %v798_v16 = vld [vmem:[%s984_s1 + $0x30] sm:$0xff]   ;;  %v800_v18 = vld [vmem:[%s984_s1 + $0x38] sm:$0xff]  }
  0x1c   : > { %707 = vmatpush3.bf16.msra.mxu0 %v788_v4  ;;  %753 = vmatpush3.bf16.msra.mxu1 %v788_v4  ;;  %v801_v19 = vld [vmem:[%s899_s20] ss:$8 sps:$4 sm:$0xff]   ;;  %v807_v21 = vld [vmem:[%s899_s20 + $0x14] ss:$8 sps:$4 sm:$0xff]   ;;  %v811_v23 = vld [vmem:[%s899_s20 + $0x10] ss:$8 sps:$4 sm:$0xff]  }
  0x1d   : > { %708 = vmatprep.subr.bf16.mxu0 %v789_v5  ;;  %746 = vmatprep.subr.bf16.mxu1 %v789_v5  ;;  %v804_v20 = vld [vmem:[%s899_s20 + $0x20] ss:$8 sps:$4 sm:$0xff]   ;;  %v809_v22 = vld [vmem:[%s899_s20 + $0x34] ss:$8 sps:$4 sm:$0xff]   ;;  %v812_v24 = vld [vmem:[%s899_s20 + $0x30] ss:$8 sps:$4 sm:$0xff]  }
  0x1e   : > { %455 = vmatprep.mubr.bf16.mxu1 %v806_v13  ;;  %v634_v27 = vld [vmem:[%s985_s2] ss:$0 sm:$0xff]  ;;  %v257_v61 = vld [vmem:[#allocation2 + $0x8] sm:$0xff]  ;;  %v263_v12 = vld [vmem:[#allocation2 + $0x38] sm:$0xff] }
  0x1f   : > { %v256_v56 = vld [vmem:[#allocation2] sm:$0xff]  ;;  %v261_v0 = vld [vmem:[#allocation2 + $0x28] sm:$0xff] }
  0x20   : > { %709 = vmatpush3.bf16.msra.mxu0 %v790_v6  ;;  %754 = vmatpush3.bf16.msra.mxu1 %v790_v6  ;;  %v260_v59 = vld [vmem:[#allocation2 + $0x20] sm:$0xff]  ;;  %v258_v6 = vld [vmem:[#allocation2 + $0x10] sm:$0xff] }
  0x21   : > { %710 = vmatprep.subr.bf16.mxu0 %v791_v7  ;;  %747 = vmatprep.subr.bf16.mxu1 %v791_v7  ;;  %v262_v7 = vld [vmem:[#allocation2 + $0x30] sm:$0xff] }
  0x24   : > { %711 = vmatpush3.bf16.msra.mxu0 %v792_v8  ;;  %755 = vmatpush3.bf16.msra.mxu1 %v792_v8 }
  0x25   : > { %712 = vmatprep.subr.bf16.mxu0 %v793_v9  ;;  %748 = vmatprep.subr.bf16.mxu1 %v793_v9  ;;  %v259_v9 = vld [vmem:[#allocation2 + $0x18] sm:$0xff] }
  0x28   : > { %713 = vmatpush3.bf16.msra.mxu0 %v794_v10  ;;  %756 = vmatpush3.bf16.msra.mxu1 %v794_v10 }
  0x29   : > { %714 = vmatprep.subr.bf16.mxu0 %v795_v11  ;;  %749 = vmatprep.subr.bf16.mxu1 %v795_v11 }
  0x2c   : > { %715 = vmatpush3.bf16.msra.mxu0 %v796_v14  ;;  %757 = vmatpush3.bf16.msra.mxu1 %v796_v14 }
  0x2d   : > { %716 = vmatprep.subr.bf16.mxu0 %v797_v15  ;;  %750 = vmatprep.subr.bf16.mxu1 %v797_v15 }
  0x30   : > { %717 = vmatpush3.bf16.msra.mxu0 %v798_v16  ;;  %758 = vmatpush3.bf16.msra.mxu1 %v798_v16 }
  0x31   : > { %718 = vmatprep.subr.bf16.mxu0 %v799_v17  ;;  %751 = vmatprep.subr.bf16.mxu1 %v799_v17 }
  0x34   : > { %719 = vmatpush3.bf16.msra.mxu0 %v800_v18  ;;  %759 = vmatpush3.bf16.msra.mxu1 %v800_v18 }
  0x37   : > { %440 = vmatmul.mubr.bf16.vlgmr.msra.gmra.mrb[0].mxu0 %v801_v19  ;;  %456 = vmatmul.mubr.bf16.vlgmr.msra.gmra.mrb[0].mxu1 %v804_v20 }
  0x38   : > { %447 = vmatprep.mubr.bf16.mxu0 %v807_v21  ;;  %463 = vmatprep.mubr.bf16.mxu1 %v809_v22 }
  0x3f   : > { %448 = vmatmul.mubr.bf16.gmra.mrb[4].mxu0 %v811_v23  ;;  %464 = vmatmul.mubr.bf16.gmra.mrb[4].mxu1 %v812_v24 }
 0x10a   : > { %v720_v25 = vpop.f32.mrb[0].mxu0  ;;  %v732_v26 = vpop.f32.mrb[0].mxu1 }
 0x10b   : > { %v721_v28 = vpop.f32.mrb[1].mxu0  ;;  %v733_v29 = vpop.f32.mrb[1].mxu1 }
 0x10c   : > { %v722_v30 = vadd.f32 %v721_v28, %v720_v25  ;;  %v734_v31 = vadd.f32 %v733_v29, %v732_v26  ;;  %v723_v32 = vpop.f32.mrb[2].mxu0  ;;  %v735_v33 = vpop.f32.mrb[2].mxu1 }
 0x10d   : > { %v724_v34 = vpop.f32.mrb[3].mxu0  ;;  %v736_v35 = vpop.f32.mrb[3].mxu1 }
 0x10e   : > { %v442_v36 = vadd.f32 %v722_v30, %v634_v27  ;;  %v458_v37 = vadd.f32 %v734_v31, %v634_v27  ;;  %v725_v38 = vadd.f32 %v724_v34, %v723_v32  ;;  %v737_v39 = vadd.f32 %v736_v35, %v735_v33 }
 0x110   : > { %813 = vtanh.f32 %v442_v36  ;;  %v445_v40 = vadd.f32 %v725_v38, %v634_v27  ;;  %v461_v41 = vadd.f32 %v737_v39, %v634_v27 }
 0x111   : > { %815 = vtanh.f32 %v458_v37 }
 0x112   : > { %817 = vtanh.f32 %v445_v40  ;;  %v726_v42 = vpop.f32.mrb[4].mxu0  ;;  %v738_v43 = vpop.f32.mrb[4].mxu1 }
 0x113   : > { %819 = vtanh.f32 %v461_v41  ;;  %v727_v44 = vpop.f32.mrb[5].mxu0  ;;  %v739_v45 = vpop.f32.mrb[5].mxu1 }
 0x114   : > { %v728_v46 = vadd.f32 %v727_v44, %v726_v42  ;;  %v740_v47 = vadd.f32 %v739_v45, %v738_v43  ;;  %v729_v48 = vpop.f32.mrb[6].mxu0  ;;  %v741_v49 = vpop.f32.mrb[6].mxu1 }
 0x115   : > { %v730_v50 = vpop.f32.mrb[7].mxu0  ;;  %v742_v51 = vpop.f32.mrb[7].mxu1 }
 0x116   : > { %v450_v52 = vadd.f32 %v728_v46, %v634_v27  ;;  %v466_v53 = vadd.f32 %v740_v47, %v634_v27  ;;  %v731_v54 = vadd.f32 %v730_v50, %v729_v48  ;;  %v743_v55 = vadd.f32 %v742_v51, %v741_v49 }
 0x118   : > { %821 = vtanh.f32 %v450_v52  ;;  %v453_v57 = vadd.f32 %v731_v54, %v634_v27  ;;  %v469_v58 = vadd.f32 %v743_v55, %v634_v27 }
 0x119   : > { %823 = vtanh.f32 %v466_v53 }
 0x11a   : > { %v814_v60 = vpop.eup %813  ;;  %825 = vtanh.f32 %v453_v57 }
 0x11b   : > { %v816_v62 = vpop.eup %815  ;;  %v480_v63 = vadd.f32 %v814_v60, %v256_v56  ;;  %827 = vtanh.f32 %v469_v58 }
 0x11c   : > { %v818_v1 = vpop.eup %817  ;;  %v484_v2 = vadd.f32 %v816_v62, %v260_v59 }
 0x11d   : > { %v820_v3 = vpop.eup %819  ;;  %488 = vst [vmem:[#allocation2] sm:$0xff] %v480_v63  ;;  %v481_v4 = vadd.f32 %v818_v1, %v257_v61 }
 0x11e   : > { %492 = vst [vmem:[#allocation2 + $0x20] sm:$0xff] %v484_v2  ;;  %v485_v5 = vadd.f32 %v820_v3, %v261_v0 }
 0x11f   : > { %489 = vst [vmem:[#allocation2 + $0x8] sm:$0xff] %v481_v4 }
 0x120   : > { %493 = vst [vmem:[#allocation2 + $0x28] sm:$0xff] %v485_v5 }
 0x122   : > { %v822_v8 = vpop.eup %821  ;;  %499 = sbr.rel (%p659_p6) target bundleno = 309 (0x135), region = 40 }
 0x123   : > { %v824_v10 = vpop.eup %823  ;;  %v482_v11 = vadd.f32 %v822_v8, %v258_v6 }
 0x124   : > { %v826_v13 = vpop.eup %825  ;;  %v486_v14 = vadd.f32 %v824_v10, %v262_v7  ;;  %v500_v18 = vld [vmem:[#allocation2] sm:$0xff] (!%p659_p6) }
 0x125   : > { %v828_v15 = vpop.eup %827  ;;  %490 = vst [vmem:[#allocation2 + $0x10] sm:$0xff] %v482_v11  ;;  %v483_v16 = vadd.f32 %v826_v13, %v259_v9  ;;  %v508_v21 = vmul.f32 (!%p659_p6), 0.25, %v500_v18  ;;  %v504_v25 = vld [vmem:[#allocation2 + $0x20] sm:$0xff] (!%p659_p6) }
 0x126   : > { %494 = vst [vmem:[#allocation2 + $0x30] sm:$0xff] %v486_v14  ;;  %v487_v17 = vadd.f32 %v828_v15, %v263_v12  ;;  %v501_v19 = vld [vmem:[#allocation2 + $0x8] sm:$0xff] (!%p659_p6)  ;;  %v512_v28 = vmul.f32 (!%p659_p6), 0.25, %v504_v25 }
 0x127   : > { %491 = vst [vmem:[#allocation2 + $0x18] sm:$0xff] %v483_v16  ;;  %v509_v22 = vmul.f32 (!%p659_p6), 0.25, %v501_v19  ;;  %v505_v26 = vld [vmem:[#allocation2 + $0x28] sm:$0xff] (!%p659_p6) }
 0x128   : > { %495 = vst [vmem:[#allocation2 + $0x38] sm:$0xff] %v487_v17  ;;  %v513_v29 = vmul.f32 (!%p659_p6), 0.25, %v505_v26 }
 0x129   : > { %v684_v32 = vpack.c.bf16 %v509_v22, %v508_v21 }
 0x12a   : > { %v694_v36 = vpack.c.bf16 %v513_v29, %v512_v28 }
 0x12b   : > { %685 = vst [vmem:[%s986_s3] sm:$0xff] %v684_v32  }
 0x12c   : > { %v502_v20 = vld [vmem:[#allocation2 + $0x10] sm:$0xff]  ;;  %702 = vst [vmem:[%s986_s3 + $0x10] sm:$0xff] %v694_v36  }
 0x12d   : > { %v510_v24 = vmul.f32 0.25, %v502_v20  ;;  %v506_v30 = vld [vmem:[#allocation2 + $0x30] sm:$0xff] }
 0x12e   : > { %v503_v23 = vld [vmem:[#allocation2 + $0x18] sm:$0xff]  ;;  %v514_v33 = vmul.f32 0.25, %v506_v30 }
 0x12f   : > { %v511_v27 = vmul.f32 0.25, %v503_v23  ;;  %v507_v31 = vld [vmem:[#allocation2 + $0x38] sm:$0xff] }
 0x130   : > { %v515_v34 = vmul.f32 0.25, %v507_v31 }
 0x131   : > { %v689_v35 = vpack.c.bf16 %v511_v27, %v510_v24 }
 0x132   : > { %v699_v37 = vpack.c.bf16 %v515_v34, %v514_v33 }
 0x133   : > { %701 = vst [vmem:[%s986_s3 + $0x8] sm:$0xff] %v689_v35  }
 0x134   : > { %703 = vst [vmem:[%s986_s3 + $0x18] sm:$0xff] %v699_v37  }
 0x135 PF: > { %s13_s14 = sadd.s32 1, %s851_s14   ;;  %s987_s12 = smov %s847_s13 }
 0x136   : > { %p10_p7 = scmp.ge.s32.totalorder %s13_s14, 6   ;;  %s988_s13 = smov %s990_s15 }
 0x138   :  { %12 = sbr.rel (!%p10_p7) target bundleno = 2 (0x2), region = 70 }

// kernel: lenet_forward.5
= control target key start
LH: loop header
LB: loop body
LE: loop exit
PB: predicated region body
PF: predicated region fallthrough
CT: control target
= control target key end

     0   :  { %v853_v34 = vmov 0.0   ;;  %vm854_vm0 = vmmov 0   ;;  %s1084_s1 = inlined_call_operand.vmem [shape: bf16[512,128], index: 1, kind: input, shape index: {}]   ;;  %s1085_s0 = inlined_call_operand.vmem [shape: bf16[16,512], index: 0, kind: input, shape index: {}]   ;;  %s1086_s3 = inlined_call_operand.vmem [shape: bf16[128,128], index: 3, kind: input, shape index: {}]   ;;  %s1087_s5 = inlined_call_operand.vmem [shape: bf16[128,128], index: 5, kind: input, shape index: {}]   ;;  %s1088_s2 = inlined_call_operand.vmem [shape: f32[1,128], index: 2, kind: input, shape index: {}]   ;;  %s1089_s4 = inlined_call_operand.vmem [shape: f32[1,128], index: 4, kind: input, shape index: {}]   ;;  %s1090_s6 = inlined_call_operand.vmem [shape: f32[1,128], index: 6, kind: input, shape index: {}]   ;;  %s1091_s7 = inlined_call_operand.vmem [shape: f32[16,128], index: 7, kind: output, shape index: {}]  }
   0x1   :  { %v791_v0 = vld [vmem:[%s1084_s1 + $0x40] sm:$0xff]   ;;  %v795_v4 = vld [vmem:[%s1084_s1 + $0x48] sm:$0xff]   ;;  %v799_v8 = vld [vmem:[%s1084_s1 + $0x50] sm:$0xff]  }
   0x2   :  { %v792_v1 = vld [vmem:[%s1084_s1 + $0xc0] sm:$0xff]   ;;  %687 = vmatprep.subr.bf16.mxu0 %v791_v0  ;;  %v796_v5 = vld [vmem:[%s1084_s1 + $0xc8] sm:$0xff]   ;;  %v800_v9 = vld [vmem:[%s1084_s1 + $0xd0] sm:$0xff]  }
   0x3   :  { %v793_v2 = vld [vmem:[%s1084_s1] sm:$0xff]   ;;  %709 = vmatprep.subr.bf16.mxu1 %v792_v1  ;;  %v797_v6 = vld [vmem:[%s1084_s1 + $0x8] sm:$0xff]   ;;  %v801_v10 = vld [vmem:[%s1084_s1 + $0x10] sm:$0xff]  }
   0x4   :  { %v794_v3 = vld [vmem:[%s1084_s1 + $0x80] sm:$0xff]   ;;  %688 = vmatpush3.bf16.msra.mxu0 %v793_v2  ;;  %v798_v7 = vld [vmem:[%s1084_s1 + $0x88] sm:$0xff]   ;;  %v802_v11 = vld [vmem:[%s1084_s1 + $0x90] sm:$0xff]  }
   0x5   :  { %710 = vmatpush3.bf16.msra.mxu1 %v794_v3  ;;  %689 = vmatprep.subr.bf16.mxu0 %v795_v4  ;;  %v803_v12 = vld [vmem:[%s1084_s1 + $0x58] sm:$0xff]   ;;  %v807_v16 = vld [vmem:[%s1084_s1 + $0x60] sm:$0xff]   ;;  %v811_v20 = vld [vmem:[%s1084_s1 + $0x68] sm:$0xff]  }
   0x6   :  { %711 = vmatprep.subr.bf16.mxu1 %v796_v5  ;;  %v804_v13 = vld [vmem:[%s1084_s1 + $0xd8] sm:$0xff]   ;;  %v808_v17 = vld [vmem:[%s1084_s1 + $0xe0] sm:$0xff]   ;;  %v812_v21 = vld [vmem:[%s1084_s1 + $0xe8] sm:$0xff]  }
   0x7   :  { %v805_v14 = vld [vmem:[%s1084_s1 + $0x18] sm:$0xff]   ;;  %v809_v18 = vld [vmem:[%s1084_s1 + $0x20] sm:$0xff]   ;;  %v813_v22 = vld [vmem:[%s1084_s1 + $0x28] sm:$0xff]  }
   0x8   :  { %690 = vmatpush3.bf16.msra.mxu0 %v797_v6  ;;  %v806_v15 = vld [vmem:[%s1084_s1 + $0x98] sm:$0xff]   ;;  %v810_v19 = vld [vmem:[%s1084_s1 + $0xa0] sm:$0xff]   ;;  %v814_v23 = vld [vmem:[%s1084_s1 + $0xa8] sm:$0xff]  }
   0x9   :  { %712 = vmatpush3.bf16.msra.mxu1 %v798_v7  ;;  %691 = vmatprep.subr.bf16.mxu0 %v799_v8  ;;  %v815_v24 = vld [vmem:[%s1084_s1 + $0x70] sm:$0xff]   ;;  %v819_v28 = vld [vmem:[%s1084_s1 + $0x78] sm:$0xff]   ;;  %v829_v37 = vld [vmem:[%s1086_s3] sm:$0xff]  }
   0xa   :  { %713 = vmatprep.subr.bf16.mxu1 %v800_v9  ;;  %v816_v25 = vld [vmem:[%s1084_s1 + $0xf0] sm:$0xff]   ;;  %v820_v29 = vld [vmem:[%s1084_s1 + $0xf8] sm:$0xff]   ;;  %v830_v38 = vld [vmem:[%s1086_s3 + $0x8] sm:$0xff]  }
   0xb   :  { %v817_v26 = vld [vmem:[%s1084_s1 + $0x30] sm:$0xff]   ;;  %v821_v30 = vld [vmem:[%s1084_s1 + $0x38] sm:$0xff]   ;;  %v833_v41 = vld [vmem:[%s1086_s3 + $0x20] sm:$0xff]  }
   0xc   :  { %692 = vmatpush3.bf16.msra.mxu0 %v801_v10  ;;  %v818_v27 = vld [vmem:[%s1084_s1 + $0xb0] sm:$0xff]   ;;  %v822_v31 = vld [vmem:[%s1084_s1 + $0xb8] sm:$0xff]   ;;  %v834_v42 = vld [vmem:[%s1086_s3 + $0x28] sm:$0xff]  }
   0xd   :  { %714 = vmatpush3.bf16.msra.mxu1 %v802_v11  ;;  %693 = vmatprep.subr.bf16.mxu0 %v803_v12  ;;  %v823_v32 = vld [vmem:[%s1085_s0] ss:$16 sps:$4 sm:$0xff]   ;;  %v825_v33 = vld [vmem:[%s1085_s0 + $0x4] ss:$16 sps:$4 sm:$0xff]   ;;  %v826_v35 = vld [vmem:[%s1085_s0 + $0x8] ss:$16 sps:$4 sm:$0xff]  }
   0xe   :  { %715 = vmatprep.subr.bf16.mxu1 %v804_v13  ;;  %v828_v36 = vld [vmem:[%s1085_s0 + $0xc] ss:$16 sps:$4 sm:$0xff]   ;;  %346 = vmatprep.mubr.bf16.mxu0 %v825_v33  ;;  %v831_v39 = vld [vmem:[%s1086_s3 + $0x10] sm:$0xff]   ;;  %v837_v45 = vld [vmem:[%s1087_s5] sm:$0xff]  }
   0xf   :  { %387 = vmatprep.mubr.bf16.mxu1 %v828_v36  ;;  %v832_v40 = vld [vmem:[%s1086_s3 + $0x18] sm:$0xff]   ;;  %v835_v43 = vld [vmem:[%s1086_s3 + $0x30] sm:$0xff]   ;;  %v838_v46 = vld [vmem:[%s1087_s5 + $0x8] sm:$0xff]  }
  0x10   :  { %694 = vmatpush3.bf16.msra.mxu0 %v805_v14  ;;  %v836_v44 = vld [vmem:[%s1086_s3 + $0x38] sm:$0xff]   ;;  %v839_v47 = vld [vmem:[%s1087_s5 + $0x10] sm:$0xff]   ;;  %v632_v51 = vld [vmem:[%s1088_s2] ss:$0 sm:$0xff] }
  0x11   :  { %716 = vmatpush3.bf16.msra.mxu1 %v806_v15  ;;  %695 = vmatprep.subr.bf16.mxu0 %v807_v16  ;;  %v840_v48 = vld [vmem:[%s1087_s5 + $0x18] sm:$0xff]   ;;  %v841_v5 = vld [vmem:[%s1087_s5 + $0x20] sm:$0xff]   ;;  %v842_v6 = vld [vmem:[%s1087_s5 + $0x28] sm:$0xff]  }
  0x12   :  { %717 = vmatprep.subr.bf16.mxu1 %v808_v17  ;;  %v843_v7 = vld [vmem:[%s1087_s5 + $0x30] sm:$0xff]   ;;  %v844_v8 = vld [vmem:[%s1087_s5 + $0x38] sm:$0xff]   ;;  %v669_v9 = vld [vmem:[%s1089_s4] ss:$0 sm:$0xff] }
  0x14   :  { %696 = vmatpush3.bf16.msra.mxu0 %v809_v18 }
  0x15   :  { %718 = vmatpush3.bf16.msra.mxu1 %v810_v19  ;;  %697 = vmatprep.subr.bf16.mxu0 %v811_v20  ;;  %v678_v19 = vld [vmem:[%s1090_s6] ss:$0 sm:$0xff] }
  0x16   :  { %719 = vmatprep.subr.bf16.mxu1 %v812_v21 }
  0x18   :  { %698 = vmatpush3.bf16.msra.mxu0 %v813_v22 }
  0x19   :  { %720 = vmatpush3.bf16.msra.mxu1 %v814_v23  ;;  %699 = vmatprep.subr.bf16.mxu0 %v815_v24 }
  0x1a   :  { %721 = vmatprep.subr.bf16.mxu1 %v816_v25 }
  0x1c   :  { %700 = vmatpush3.bf16.msra.mxu0 %v817_v26 }
  0x1d   :  { %722 = vmatpush3.bf16.msra.mxu1 %v818_v27  ;;  %701 = vmatprep.subr.bf16.mxu0 %v819_v28 }
  0x1e   :  { %723 = vmatprep.subr.bf16.mxu1 %v820_v29 }
  0x20   :  { %702 = vmatpush3.bf16.msra.mxu0 %v821_v30 }
  0x21   :  { %724 = vmatpush3.bf16.msra.mxu1 %v822_v31  ;;  %749 = vmatprep.subr.bf16.mxu0 %v853_v34 }
  0x22   :  { %769 = vmatprep.subr.bf16.mxu1 %v853_v34 }
  0x23   :  { %347 = vmatmul.mubr.bf16.vlgmr.msra.gmra.mrb[0].mxu0 %v823_v32 }
  0x24   :  { %388 = vmatmul.mubr.bf16.vlgmr.msra.gmra.mrb[0].mxu1 %v826_v35  ;;  %750 = vmatpush3.bf16.msra.mxu0 %v829_v37 }
  0x25   :  { %751 = vmatprep.subr.bf16.mxu0 %v853_v34  ;;  %765 = vmatprep.mubr.msk.bf16.mxu0 %vm854_vm0, %v853_v34 }
  0x26   :  { %785 = vmatprep.mubr.msk.bf16.mxu1 %vm854_vm0, %v853_v34  ;;  %770 = vmatpush3.bf16.msra.mxu1 %v837_v45 }
  0x27   :  { %771 = vmatprep.subr.bf16.mxu1 %v853_v34 }
  0x28   :  { %752 = vmatpush3.bf16.msra.mxu0 %v830_v38 }
  0x29   :  { %753 = vmatprep.subr.bf16.mxu0 %v853_v34 }
  0x2a   :  { %772 = vmatpush3.bf16.msra.mxu1 %v838_v46 }
  0x2b   :  { %773 = vmatprep.subr.bf16.mxu1 %v853_v34 }
  0x2c   :  { %754 = vmatpush3.bf16.msra.mxu0 %v831_v39 }
  0x2d   :  { %755 = vmatprep.subr.bf16.mxu0 %v853_v34 }
  0x2e   :  { %774 = vmatpush3.bf16.msra.mxu1 %v839_v47 }
  0x2f   :  { %775 = vmatprep.subr.bf16.mxu1 %v853_v34 }
  0x30   :  { %756 = vmatpush3.bf16.msra.mxu0 %v832_v40 }
  0x31   :  { %757 = vmatprep.subr.bf16.mxu0 %v853_v34 }
  0x32   :  { %776 = vmatpush3.bf16.msra.mxu1 %v840_v48 }
  0x33   :  { %777 = vmatprep.subr.bf16.mxu1 %v853_v34 }
  0x34   :  { %758 = vmatpush3.bf16.msra.mxu0 %v833_v41 }
  0x35   :  { %759 = vmatprep.subr.bf16.mxu0 %v853_v34 }
  0x36   :  { %778 = vmatpush3.bf16.msra.mxu1 %v841_v5 }
  0x37   :  { %779 = vmatprep.subr.bf16.mxu1 %v853_v34 }
  0x38   :  { %760 = vmatpush3.bf16.msra.mxu0 %v834_v42 }
  0x39   :  { %761 = vmatprep.subr.bf16.mxu0 %v853_v34 }
  0x3a   :  { %780 = vmatpush3.bf16.msra.mxu1 %v842_v6 }
  0x3b   :  { %781 = vmatprep.subr.bf16.mxu1 %v853_v34 }
  0x3c   :  { %762 = vmatpush3.bf16.msra.mxu0 %v835_v43 }
  0x3d   :  { %763 = vmatprep.subr.bf16.mxu0 %v853_v34 }
  0x3e   :  { %782 = vmatpush3.bf16.msra.mxu1 %v843_v7 }
  0x3f   :  { %783 = vmatprep.subr.bf16.mxu1 %v853_v34 }
  0x40   :  { %764 = vmatpush3.bf16.msra.mxu0 %v836_v44 }
  0x42   :  { %784 = vmatpush3.bf16.msra.mxu1 %v844_v8 }
  0xf6   :  { %v703_v49 = vpop.f32.mrb[0].mxu0 }
  0xf7   :  { %v725_v50 = vpop.f32.mrb[0].mxu1  ;;  %v704_v52 = vpop.f32.mrb[1].mxu0 }
  0xf8   :  { %v705_v53 = vadd.f32 %v704_v52, %v703_v49  ;;  %v726_v54 = vpop.f32.mrb[1].mxu1  ;;  %v706_v55 = vpop.f32.mrb[2].mxu0 }
  0xf9   :  { %v727_v56 = vadd.f32 %v726_v54, %v725_v50  ;;  %v728_v57 = vpop.f32.mrb[2].mxu1  ;;  %v707_v58 = vpop.f32.mrb[3].mxu0 }
  0xfa   :  { %v349_v59 = vadd.f32 %v705_v53, %v632_v51  ;;  %v708_v60 = vadd.f32 %v707_v58, %v706_v55  ;;  %v729_v61 = vpop.f32.mrb[3].mxu1 }
  0xfb   :  { %v730_v62 = vadd.f32 %v729_v61, %v728_v57 }
  0xfc   :  { %v390_v63 = vadd.f32 %v727_v56, %v349_v59  ;;  %v352_v0 = vadd.f32 %v708_v60, %v632_v51 }
  0xfe   :  { %v393_v1 = vadd.f32 %v730_v62, %v352_v0  ;;  %845 = vtanh.f32 %v390_v63 }
 0x100   :  { %847 = vtanh.f32 %v393_v1 }
 0x108   :  { %v846_v2 = vpop.eup %845 }
 0x10a   :  { %v848_v3 = vpop.eup %847 }
 0x10b   :  { %v398_v4 = vpack.c.bf16 %v848_v3, %v846_v2 }
 0x10d   :  { %766 = vmatmul.mubr.bf16.vlgmr.msra.gmra.mrb[4].mxu0 %v398_v4 }
 0x1e0   :  { %v504_v10 = vpop.f32.mrb[4].mxu0 }
 0x1e1   :  { %v505_v11 = vadd.f32 %v669_v9, %v504_v10  ;;  %v767_v12 = vpop.f32.mrb[5].mxu0 }
 0x1e2   :  { %v507_v13 = vpop.f32.mrb[6].mxu0 }
 0x1e3   :  { %v508_v14 = vadd.f32 %v669_v9, %v507_v13  ;;  %v768_v15 = vpop.f32.mrb[7].mxu0  ;;  %849 = vtanh.f32 %v505_v11 }
 0x1e5   :  { %851 = vtanh.f32 %v508_v14 }
 0x1ed   :  { %v850_v16 = vpop.eup %849 }
 0x1ef   :  { %v852_v17 = vpop.eup %851 }
 0x1f0   :  { %v513_v18 = vpack.c.bf16 %v852_v17, %v850_v16 }
 0x1f2   :  { %786 = vmatmul.mubr.bf16.vlgmr.msra.gmra.mrb[4].mxu1 %v513_v18 }
 0x2c5   :  { %v619_v20 = vpop.f32.mrb[4].mxu1 }
 0x2c6   :  { %v620_v21 = vadd.f32 %v678_v19, %v619_v20  ;;  %v787_v22 = vpop.f32.mrb[5].mxu1 }
 0x2c7   :  { %v622_v23 = vpop.f32.mrb[6].mxu1 }
 0x2c8   :  { %626 = vst [vmem:[%s1091_s7] sm:$0xff] %v620_v21  ;;  %v623_v24 = vadd.f32 %v678_v19, %v622_v23  ;;  %v788_v25 = vpop.f32.mrb[7].mxu1 }
 0x2ca   :  { %627 = vst [vmem:[%s1091_s7 + $0x8] sm:$0xff] %v623_v24 }

</bundles_post_ra>
